<compile_context>
chip_gen: v7x
topology: tpu7x:2x2x1
jax: 0.10.0
libtpu: 0.0.40
codegen_flags: <defaults>
</compile_context>

<pallas_src>
import jax
import jax.numpy as jnp
from jax.experimental import pallas as pl
from jax.experimental.pallas import tpu as pltpu

LN_EPS = 1e-5      # PyTorch nn.LayerNorm default
H1, H2 = 256, 64   # hidden sizes fixed by the module


def _round_up(n, m):
    return ((n + m - 1) // m) * m


def _vmem_limit_bytes():
    """~75% of physical VMEM: 48 MiB on v7x (64 MiB/TC), 96 MiB on v5e/v6e."""
    try:
        cap = pltpu.get_tpu_info().vmem_capacity_bytes
    except Exception:
        cap = 64 * 1024 * 1024            # assume smallest (v7x per-TC) if query fails
    return max(32 * 1024 * 1024, min((cap * 3) // 4, 100 * 1024 * 1024))


def _choose_tile_b(B, F, vmem_limit, cap=2048):
    """Largest multiple-of-128 batch tile that fits the VMEM budget (<= cap)."""
    B128 = _round_up(B, 128)
    # bytes that scale with tile_b: x double-buffer (f32) + f32/bf16
    # intermediates (generous 8*(H1+H2) B/row) + output double-buffer.
    per_row = 2 * F * 4 + 8 * (H1 + H2) + 2 * 4
    # resident (constant-index-map) params, counted double-buffered for safety.
    resident = 2 * (F * H1 * 2 + H1 * H2 * 2 + (3 * H1 + 3 * H2 + H2) * 4 + 128)
    headroom = 8 * 1024 * 1024            # compiler scratch
    budget = max(vmem_limit - headroom - resident, per_row * 128)
    tile_b = (budget // per_row) // 128 * 128
    tile_b = max(128, min(tile_b, cap, B128))
    # v7x megacore: guarantee >= 2 grid steps whenever the batch allows it.
    if B128 >= 256:
        split = _round_up((B128 + 1) // 2, 128)
        tile_b = min(tile_b, split)
    return tile_b


def _layernorm(h, gamma, beta, inv_n):
    # Single-pass LN: two *independent* cross-lane reductions (XLU can overlap
    # them), biased variance via E[x^2]-mu^2, then normalize + affine.
    s1 = jnp.sum(h, axis=-1, keepdims=True)
    s2 = jnp.sum(h * h, axis=-1, keepdims=True)
    mu = s1 * inv_n
    var = s2 * inv_n - mu * mu
    rstd = jax.lax.rsqrt(var + LN_EPS)
    return (h - mu) * rstd * gamma + beta


def traffic_mlp_kernel(x_ref, w1_ref, ln1_ref, w2_ref, ln2_ref, w3_ref, b3_ref,
                       o_ref):
    # ---- Linear(F, 256) -> LayerNorm(256) -> ReLU -> Dropout ----
    # bf16 MXU operands (cast in-kernel on the VPU), f32 accumulation.
    x = x_ref[...].astype(jnp.bfloat16)
    h = jnp.dot(x, w1_ref[...], preferred_element_type=jnp.float32)
    h = h + ln1_ref[0:1, :]                                   # bias b1
    h = _layernorm(h, ln1_ref[1:2, :], ln1_ref[2:3, :], 1.0 / H1)
    h = jnp.maximum(h, 0.0)
    # Dropout(p=0.2): identity under eval()/inference semantics.
    # TODO(synk): training-mode dropout (pltpu.prng_seed + prng_random_bits mask) not emitted.

    # ---- Linear(256, 64) -> LayerNorm(64) -> ReLU ----
    h = jnp.dot(h.astype(jnp.bfloat16), w2_ref[...],
                preferred_element_type=jnp.float32)
    h = h + ln2_ref[0:1, :]                                   # bias b2
    h = _layernorm(h, ln2_ref[1:2, :], ln2_ref[2:3, :], 1.0 / H2)
    h = jnp.maximum(h, 0.0)

    # ---- Linear(64, 1) ----
    # Contract the 64 features, keep the batch on the lane axis:
    # (1,64) x (TILE_B,64) contracting both last dims -> (1,TILE_B).
    # This is a trans_b matmul; any layout fix-up lands on the tiny (1,64)
    # operand, and the output store is lane-dense (unmasked vst, dense DMA).
    out = jax.lax.dot_general(w3_ref[...], h, (((1,), (1,)), ((), ())),
                              preferred_element_type=jnp.float32)
    o_ref[...] = (out + b3_ref[0]).astype(o_ref.dtype)


def traffic_model_forward(x, kparams, *, tile_b=None):
    """x: (B, F) float32. kparams: output of pack_params(). Returns (B,1) f32."""
    B, F = x.shape
    vmem_limit = _vmem_limit_bytes()
    if tile_b is None:
        tile_b = _choose_tile_b(B, F, vmem_limit)
    B_pad = _round_up(B, tile_b)
    num_tiles = B_pad // tile_b

    x_p = jnp.pad(x, ((0, B_pad - B), (0, 0)))   # no-op when B % tile_b == 0

    args = (x_p, kparams["w1"], kparams["ln1"], kparams["w2"], kparams["ln2"],
            kparams["w3"], kparams["b3"])

    const = lambda i: (0, 0)   # params stay VMEM-resident across batch tiles
    in_specs = [
        pl.BlockSpec((tile_b, F), lambda i: (i, 0)),               # x (pipelined)
        pl.BlockSpec((F, H1), const),                              # w1 (bf16)
        pl.BlockSpec((3, H1), const),                              # [b1; g1; be1]
        pl.BlockSpec((H1, H2), const),                             # w2 (bf16)
        pl.BlockSpec((3, H2), const),                              # [b2; g2; be2]
        pl.BlockSpec((1, H2), const),                              # w3 row vector
        pl.BlockSpec(memory_space=pltpu.MemorySpace.SMEM),         # b3 scalar
    ]

    flops = 2 * B_pad * (F * H1 + H1 * H2 + H2) + 10 * B_pad * (H1 + H2)
    bytes_accessed = (x_p.size * 4 + B_pad * 4
                      + kparams["w1"].size * 2 + kparams["w2"].size * 2
                      + (3 * H1 + 3 * H2 + H2 + 1) * 4)

    out = pl.pallas_call(
        traffic_mlp_kernel,
        out_shape=jax.ShapeDtypeStruct((1, B_pad), jnp.float32),
        grid=(num_tiles,),
        in_specs=in_specs,
        out_specs=pl.BlockSpec((1, tile_b), lambda i: (0, i)),     # lane-dense
        compiler_params=pltpu.CompilerParams(
            dimension_semantics=("parallel",),                     # megacore on v7x
            vmem_limit_bytes=int(vmem_limit),
        ),
        cost_estimate=pl.CostEstimate(
            flops=flops,
            transcendentals=2 * B_pad,                             # one rsqrt per LN per row
            bytes_accessed=bytes_accessed,
        ),
    )(*args)

    return out.reshape(B_pad, 1)[:B]


def init_params(key, input_size):
    """Deterministic synthetic parameters matching the PyTorch module's shapes.

    PyTorch Linear weights are (out, in); we store the transpose (in, out).
    Masters are f32 (used by the reference); pack_params() pre-casts / packs
    them once for the kernel.
    """
    ks = jax.random.split(key, 6)
    f32 = jnp.float32

    def lin(kw, kb, fan_in, fan_out):
        bound = 1.0 / (fan_in ** 0.5)
        w = jax.random.uniform(kw, (fan_in, fan_out), f32, -bound, bound)
        b = jax.random.uniform(kb, (1, fan_out), f32, -bound, bound)
        return w, b

    w1, b1 = lin(ks[0], ks[1], input_size, H1)
    w2, b2 = lin(ks[2], ks[3], H1, H2)
    w3, b3 = lin(ks[4], ks[5], H2, 1)
    return {
        "w1": w1, "b1": b1,
        "g1": jnp.ones((1, H1), f32), "be1": jnp.zeros((1, H1), f32),
        "w2": w2, "b2": b2,
        "g2": jnp.ones((1, H2), f32), "be2": jnp.zeros((1, H2), f32),
        "w3": w3, "b3": b3,
    }


def pack_params(p):
    """One-time prep: bf16 matmul weights, packed LN params, SMEM-friendly b3."""
    return {
        "w1": p["w1"].astype(jnp.bfloat16),                           # (F, 256)
        "ln1": jnp.concatenate([p["b1"], p["g1"], p["be1"]], axis=0),  # (3, 256)
        "w2": p["w2"].astype(jnp.bfloat16),                           # (256, 64)
        "ln2": jnp.concatenate([p["b2"], p["g2"], p["be2"]], axis=0),  # (3, 64)
        "w3": p["w3"].reshape(1, H2).astype(jnp.float32),             # (1, 64)
        "b3": p["b3"].reshape(1).astype(jnp.float32),                 # (1,) -> SMEM
    }


def reference_forward(x, p):
    """Pure-JAX f32 reference of the same forward pass."""
    def ln(h, g, b):
        mu = jnp.mean(h, axis=-1, keepdims=True)
        var = jnp.mean((h - mu) ** 2, axis=-1, keepdims=True)
        return (h - mu) / jnp.sqrt(var + LN_EPS) * g + b

    h = jnp.maximum(ln(x @ p["w1"] + p["b1"], p["g1"], p["be1"]), 0.0)
    h = jnp.maximum(ln(h @ p["w2"] + p["b2"], p["g2"], p["be2"]), 0.0)
    return h @ p["w3"] + p["b3"]


if __name__ == "__main__":
    key = jax.random.PRNGKey(0)
    k_x, k_p = jax.random.split(key)

    batch, input_size = 8, 32
    x = jax.random.normal(k_x, (batch, input_size), jnp.float32)
    params = init_params(k_p, input_size)
    kparams = pack_params(params)          # one-time cast/pack, not per forward

    out = jax.block_until_ready(jax.jit(traffic_model_forward)(x, kparams))
    ref = reference_forward(x, params)

    assert out.shape == (batch, 1), out.shape
    # Tolerance loosened because the kernel runs the two big matmuls with bf16
    # MXU operands (f32 accumulation) and single-pass LN variance; the
    # reference is pure f32 two-pass.
    assert jnp.allclose(out, ref, atol=5e-2, rtol=5e-2), "mismatch vs JAX reference"

    print("KERNEL_OK")
</pallas_src>

<mosaic_0001>
module attributes {stable_mosaic.version = 11 : i64} {
  func.func @traffic_mlp_kernel(%arg0: i32, %arg1: memref<128x32xf32, #tpu.memory_space<vmem>>, %arg2: memref<32x256xbf16, #tpu.memory_space<vmem>>, %arg3: memref<3x256xf32, #tpu.memory_space<vmem>>, %arg4: memref<256x64xbf16, #tpu.memory_space<vmem>>, %arg5: memref<3x64xf32, #tpu.memory_space<vmem>>, %arg6: memref<1x64xf32, #tpu.memory_space<vmem>>, %arg7: memref<1xf32, #tpu.memory_space<smem>>, %arg8: memref<1x128xf32, #tpu.memory_space<vmem>>) attributes {dimension_semantics = [#tpu.dimension_semantics<parallel>], iteration_bounds = array<i64: 1>, scalar_prefetch = 0 : i64, scratch_operands = 0 : i64, tpu.core_type = #tpu.core_type<tc>, window_params = [{transform_indices = @transform_0, window_bounds = array<i64: 128, 32>}, {pipeline_mode = #tpu.pipeline_mode<synchronous>, transform_indices = @transform_1, window_bounds = array<i64: 32, 256>}, {pipeline_mode = #tpu.pipeline_mode<synchronous>, transform_indices = @transform_2, window_bounds = array<i64: 3, 256>}, {pipeline_mode = #tpu.pipeline_mode<synchronous>, transform_indices = @transform_3, window_bounds = array<i64: 256, 64>}, {pipeline_mode = #tpu.pipeline_mode<synchronous>, transform_indices = @transform_4, window_bounds = array<i64: 3, 64>}, {pipeline_mode = #tpu.pipeline_mode<synchronous>, transform_indices = @transform_5, window_bounds = array<i64: 1, 64>}, {transform_indices = @transform_6, window_bounds = array<i64: 1>}, {transform_indices = @transform_7, window_bounds = array<i64: 1, 128>}]} {
    %c0 = arith.constant 0 : index
    %c0_0 = arith.constant 0 : index
    %0 = vector.load %arg1[%c0, %c0_0] : memref<128x32xf32, #tpu.memory_space<vmem>>, vector<128x32xf32>
    %1 = arith.truncf %0 : vector<128x32xf32> to vector<128x32xbf16>
    %c0_1 = arith.constant 0 : index
    %c0_2 = arith.constant 0 : index
    %2 = vector.load %arg2[%c0_1, %c0_2] : memref<32x256xbf16, #tpu.memory_space<vmem>>, vector<32x256xbf16>
    %cst = arith.constant dense<0.000000e+00> : vector<128x256xf32>
    %3 = tpu.matmul %1, %2, %cst {dimension_numbers = #tpu.dot_dimension_numbers<[1], [0], [0], [1], [0, 0, 1, 1], [], []>} : vector<128x32xbf16>, vector<32x256xbf16>, vector<128x256xf32> -> vector<128x256xf32>
    %c0_3 = arith.constant 0 : index
    %c0_4 = arith.constant 0 : index
    %4 = vector.load %arg3[%c0_3, %c0_4] : memref<3x256xf32, #tpu.memory_space<vmem>>, vector<1x256xf32>
    %5 = vector.broadcast %4 : vector<1x256xf32> to vector<128x256xf32>
    %6 = arith.addf %3, %5 : vector<128x256xf32>
    %c1 = arith.constant 1 : index
    %c0_5 = arith.constant 0 : index
    %7 = vector.load %arg3[%c1, %c0_5] : memref<3x256xf32, #tpu.memory_space<vmem>>, vector<1x256xf32>
    %c2 = arith.constant 2 : index
    %c0_6 = arith.constant 0 : index
    %8 = vector.load %arg3[%c2, %c0_6] : memref<3x256xf32, #tpu.memory_space<vmem>>, vector<1x256xf32>
    %cst_7 = arith.constant dense<0.000000e+00> : vector<128xf32>
    %9 = vector.multi_reduction <add>, %6, %cst_7 [1] : vector<128x256xf32> to vector<128xf32>
    %10 = vector.shape_cast %9 : vector<128xf32> to vector<128x1xf32>
    %11 = arith.mulf %6, %6 : vector<128x256xf32>
    %cst_8 = arith.constant dense<0.000000e+00> : vector<128xf32>
    %12 = vector.multi_reduction <add>, %11, %cst_8 [1] : vector<128x256xf32> to vector<128xf32>
    %13 = vector.shape_cast %12 : vector<128xf32> to vector<128x1xf32>
    %cst_9 = arith.constant 3.906250e-03 : f32
    %14 = vector.broadcast %cst_9 : f32 to vector<128x1xf32>
    %15 = arith.mulf %10, %14 : vector<128x1xf32>
    %cst_10 = arith.constant 3.906250e-03 : f32
    %16 = vector.broadcast %cst_10 : f32 to vector<128x1xf32>
    %17 = arith.mulf %13, %16 : vector<128x1xf32>
    %18 = arith.mulf %15, %15 : vector<128x1xf32>
    %19 = arith.subf %17, %18 : vector<128x1xf32>
    %cst_11 = arith.constant 9.99999974E-6 : f32
    %20 = vector.broadcast %cst_11 : f32 to vector<128x1xf32>
    %21 = arith.addf %19, %20 : vector<128x1xf32>
    %22 = math.rsqrt %21 : vector<128x1xf32>
    %23 = vector.broadcast %15 : vector<128x1xf32> to vector<128x256xf32>
    %24 = arith.subf %6, %23 : vector<128x256xf32>
    %25 = vector.broadcast %22 : vector<128x1xf32> to vector<128x256xf32>
    %26 = arith.mulf %24, %25 : vector<128x256xf32>
    %27 = vector.broadcast %7 : vector<1x256xf32> to vector<128x256xf32>
    %28 = arith.mulf %26, %27 : vector<128x256xf32>
    %29 = vector.broadcast %8 : vector<1x256xf32> to vector<128x256xf32>
    %30 = arith.addf %28, %29 : vector<128x256xf32>
    %cst_12 = arith.constant 0.000000e+00 : f32
    %31 = vector.broadcast %cst_12 : f32 to vector<128x256xf32>
    %32 = arith.maximumf %30, %31 : vector<128x256xf32>
    %33 = arith.truncf %32 : vector<128x256xf32> to vector<128x256xbf16>
    %c0_13 = arith.constant 0 : index
    %c0_14 = arith.constant 0 : index
    %34 = vector.load %arg4[%c0_13, %c0_14] : memref<256x64xbf16, #tpu.memory_space<vmem>>, vector<256x64xbf16>
    %cst_15 = arith.constant dense<0.000000e+00> : vector<128x64xf32>
    %35 = tpu.matmul %33, %34, %cst_15 {dimension_numbers = #tpu.dot_dimension_numbers<[1], [0], [0], [1], [0, 0, 1, 1], [], []>} : vector<128x256xbf16>, vector<256x64xbf16>, vector<128x64xf32> -> vector<128x64xf32>
    %c0_16 = arith.constant 0 : index
    %c0_17 = arith.constant 0 : index
    %36 = vector.load %arg5[%c0_16, %c0_17] : memref<3x64xf32, #tpu.memory_space<vmem>>, vector<1x64xf32>
    %37 = vector.broadcast %36 : vector<1x64xf32> to vector<128x64xf32>
    %38 = arith.addf %35, %37 : vector<128x64xf32>
    %c1_18 = arith.constant 1 : index
    %c0_19 = arith.constant 0 : index
    %39 = vector.load %arg5[%c1_18, %c0_19] : memref<3x64xf32, #tpu.memory_space<vmem>>, vector<1x64xf32>
    %c2_20 = arith.constant 2 : index
    %c0_21 = arith.constant 0 : index
    %40 = vector.load %arg5[%c2_20, %c0_21] : memref<3x64xf32, #tpu.memory_space<vmem>>, vector<1x64xf32>
    %cst_22 = arith.constant dense<0.000000e+00> : vector<128xf32>
    %41 = vector.multi_reduction <add>, %38, %cst_22 [1] : vector<128x64xf32> to vector<128xf32>
    %42 = vector.shape_cast %41 : vector<128xf32> to vector<128x1xf32>
    %43 = arith.mulf %38, %38 : vector<128x64xf32>
    %cst_23 = arith.constant dense<0.000000e+00> : vector<128xf32>
    %44 = vector.multi_reduction <add>, %43, %cst_23 [1] : vector<128x64xf32> to vector<128xf32>
    %45 = vector.shape_cast %44 : vector<128xf32> to vector<128x1xf32>
    %cst_24 = arith.constant 1.562500e-02 : f32
    %46 = vector.broadcast %cst_24 : f32 to vector<128x1xf32>
    %47 = arith.mulf %42, %46 : vector<128x1xf32>
    %cst_25 = arith.constant 1.562500e-02 : f32
    %48 = vector.broadcast %cst_25 : f32 to vector<128x1xf32>
    %49 = arith.mulf %45, %48 : vector<128x1xf32>
    %50 = arith.mulf %47, %47 : vector<128x1xf32>
    %51 = arith.subf %49, %50 : vector<128x1xf32>
    %cst_26 = arith.constant 9.99999974E-6 : f32
    %52 = vector.broadcast %cst_26 : f32 to vector<128x1xf32>
    %53 = arith.addf %51, %52 : vector<128x1xf32>
    %54 = math.rsqrt %53 : vector<128x1xf32>
    %55 = vector.broadcast %47 : vector<128x1xf32> to vector<128x64xf32>
    %56 = arith.subf %38, %55 : vector<128x64xf32>
    %57 = vector.broadcast %54 : vector<128x1xf32> to vector<128x64xf32>
    %58 = arith.mulf %56, %57 : vector<128x64xf32>
    %59 = vector.broadcast %39 : vector<1x64xf32> to vector<128x64xf32>
    %60 = arith.mulf %58, %59 : vector<128x64xf32>
    %61 = vector.broadcast %40 : vector<1x64xf32> to vector<128x64xf32>
    %62 = arith.addf %60, %61 : vector<128x64xf32>
    %cst_27 = arith.constant 0.000000e+00 : f32
    %63 = vector.broadcast %cst_27 : f32 to vector<128x64xf32>
    %64 = arith.maximumf %62, %63 : vector<128x64xf32>
    %c0_28 = arith.constant 0 : index
    %c0_29 = arith.constant 0 : index
    %65 = vector.load %arg6[%c0_28, %c0_29] : memref<1x64xf32, #tpu.memory_space<vmem>>, vector<1x64xf32>
    %cst_30 = arith.constant dense<0.000000e+00> : vector<1x128xf32>
    %66 = tpu.matmul %65, %64, %cst_30 {dimension_numbers = #tpu.dot_dimension_numbers<[1], [1], [0], [0], [0, 0, 1, 0], [], []>} : vector<1x64xf32>, vector<128x64xf32>, vector<1x128xf32> -> vector<1x128xf32>
    %c0_31 = arith.constant 0 : index
    %67 = memref.load %arg7[%c0_31] : memref<1xf32, #tpu.memory_space<smem>>
    %68 = vector.broadcast %67 : f32 to vector<1x128xf32>
    %69 = arith.addf %66, %68 : vector<1x128xf32>
    %c0_32 = arith.constant 0 : index
    %c0_33 = arith.constant 0 : index
    %70 = vector.load %arg8[%c0_32, %c0_33] : memref<1x128xf32, #tpu.memory_space<vmem>>, vector<1x128xf32>
    tpu.vector_store %arg8[%c0_32, %c0_33], %69 {strides = array<i32>} : memref<1x128xf32, #tpu.memory_space<vmem>>, vector<1x128xf32>,
    return
  }
  func.func @transform_0(%arg0: i32) -> (i32, i32) {
    %c0_i32 = arith.constant 0 : i32
    %c0_i32_0 = arith.constant 0 : i32
    return %arg0, %c0_i32 : i32, i32
  }
  func.func @transform_1(%arg0: i32) -> (i32, i32) {
    %c0_i32 = arith.constant 0 : i32
    %c0_i32_0 = arith.constant 0 : i32
    %c0_i32_1 = arith.constant 0 : i32
    return %c0_i32, %c0_i32_0 : i32, i32
  }
  func.func @transform_2(%arg0: i32) -> (i32, i32) {
    %c0_i32 = arith.constant 0 : i32
    %c0_i32_0 = arith.constant 0 : i32
    %c0_i32_1 = arith.constant 0 : i32
    return %c0_i32, %c0_i32_0 : i32, i32
  }
  func.func @transform_3(%arg0: i32) -> (i32, i32) {
    %c0_i32 = arith.constant 0 : i32
    %c0_i32_0 = arith.constant 0 : i32
    %c0_i32_1 = arith.constant 0 : i32
    return %c0_i32, %c0_i32_0 : i32, i32
  }
  func.func @transform_4(%arg0: i32) -> (i32, i32) {
    %c0_i32 = arith.constant 0 : i32
    %c0_i32_0 = arith.constant 0 : i32
    %c0_i32_1 = arith.constant 0 : i32
    return %c0_i32, %c0_i32_0 : i32, i32
  }
  func.func @transform_5(%arg0: i32) -> (i32, i32) {
    %c0_i32 = arith.constant 0 : i32
    %c0_i32_0 = arith.constant 0 : i32
    %c0_i32_1 = arith.constant 0 : i32
    return %c0_i32, %c0_i32_0 : i32, i32
  }
  func.func @transform_6(%arg0: i32) -> i32 {
    %c0_i32 = arith.constant 0 : i32
    %c0_i32_0 = arith.constant 0 : i32
    return %c0_i32 : i32
  }
  func.func @transform_7(%arg0: i32) -> (i32, i32) {
    %c0_i32 = arith.constant 0 : i32
    %c0_i32_0 = arith.constant 0 : i32
    return %c0_i32, %arg0 : i32, i32
  }
}

</mosaic_0001>

<bundles_post_ra>
// kernel: traffic_model_forward.1
= control target key start
LH: loop header
LB: loop body
LE: loop exit
PB: predicated region body
PF: predicated region fallthrough
CT: control target
= control target key end

     0   :  { %v1598_v1 = vmov 0   ;;  %vm88_vm0 = vcmask 261120   ;;  %v58_v29 = vlaneseq  ;;  %vm884_vm1 = vcmask 523264   ;;  %s2475_s1 = inlined_call_operand.vmem [shape: bf16[32,256], index: 1, kind: input, shape index: {}]   ;;  %s2476_s0 = inlined_call_operand.vmem [shape: f32[128,32], index: 0, kind: input, shape index: {}]   ;;  %s2477_s2 = inlined_call_operand.vmem [shape: f32[3,256], index: 2, kind: input, shape index: {}]   ;;  %s2478_s3 = inlined_call_operand.vmem [shape: bf16[256,64], index: 3, kind: input, shape index: {}]   ;;  %s2479_s4 = inlined_call_operand.vmem [shape: f32[3,64], index: 4, kind: input, shape index: {}]   ;;  %s2480_s5 = inlined_call_operand.vmem [shape: f32[1,64], index: 5, kind: input, shape index: {}]   ;;  %s2481_s6 = inlined_call_operand.<no memory space> [shape: f32[1], index: 6, kind: input, shape index: {}]   ;;  %s2482_s7 = inlined_call_operand.vmem [shape: f32[1,128], index: 7, kind: output, shape index: {}]  }
   0x1   :  { %v1512_v0 = vld [vmem:[%s2475_s1 + $0x4] ss:$8 sps:$4 sm:$0xff]   ;;  %145 = vmatprep.mubr.bf16.mxu0 %v1598_v1  ;;  %v1514_v2 = vld [vmem:[%s2475_s1] ss:$8 sps:$4 sm:$0xff]   ;;  %v1515_v3 = vld [vmem:[%s2475_s1 + $0x14] ss:$8 sps:$4 sm:$0xff]  }
   0x2   :  { %113 = vmatprep.subr.bf16.mxu0 %v1512_v0  ;;  %v1517_v4 = vld [vmem:[%s2475_s1 + $0x10] ss:$8 sps:$4 sm:$0xff]   ;;  %v28_v5 = vld [vmem:[%s2476_s0] sm:$0xff]  ;;  %v29_v6 = vld [vmem:[%s2476_s0 + $0x8] sm:$0xff]  ;;  %v59_v30 = vshrl.u32 %v58_v29, 7  ;;  %vm1600_vm2 = vmmov 0  }
   0x3   :  { %114 = vmatpush1.bf16.msra.mxu0 %v1514_v2  ;;  %v44_v7 = vpack.c.bf16 %v29_v6, %v28_v5  ;;  %v30_v8 = vld [vmem:[%s2476_s0 + $0x10] sm:$0xff]  ;;  %v31_v9 = vld [vmem:[%s2476_s0 + $0x18] sm:$0xff]  ;;  %v32_v11 = vld [vmem:[%s2476_s0 + $0x20] sm:$0xff] }
   0x4   :  { %115 = vmatprep.subr.bf16.mxu0 %v1515_v3  ;;  %v45_v10 = vpack.c.bf16 %v31_v9, %v30_v8  ;;  %v33_v12 = vld [vmem:[%s2476_s0 + $0x28] sm:$0xff]  ;;  %v34_v14 = vld [vmem:[%s2476_s0 + $0x30] sm:$0xff]  ;;  %v35_v15 = vld [vmem:[%s2476_s0 + $0x38] sm:$0xff]  ;;  %v1710_v31 = vsub.s32 0, %v59_v30  ;;  %v1715_v33 = vsub.s32 1, %v59_v30 }
   0x5   :  { %v46_v13 = vpack.c.bf16 %v33_v12, %v32_v11  ;;  %v47_v16 = vpack.c.bf16 %v35_v15, %v34_v14  ;;  %v36_v17 = vld [vmem:[%s2476_s0 + $0x40] sm:$0xff]  ;;  %v37_v18 = vld [vmem:[%s2476_s0 + $0x48] sm:$0xff]  ;;  %v38_v20 = vld [vmem:[%s2476_s0 + $0x50] sm:$0xff] }
   0x6   :  { %v48_v19 = vpack.c.bf16 %v37_v18, %v36_v17  ;;  %v39_v21 = vld [vmem:[%s2476_s0 + $0x58] sm:$0xff]  ;;  %v40_v23 = vld [vmem:[%s2476_s0 + $0x60] sm:$0xff]  ;;  %v41_v24 = vld [vmem:[%s2476_s0 + $0x68] sm:$0xff] }
   0x7   :  { %116 = vmatpush1.bf16.msra.mxu0 %v1517_v4  ;;  %v49_v22 = vpack.c.bf16 %v39_v21, %v38_v20  ;;  %v50_v25 = vpack.c.bf16 %v41_v24, %v40_v23  ;;  %v42_v26 = vld [vmem:[%s2476_s0 + $0x70] sm:$0xff]  ;;  %v43_v27 = vld [vmem:[%s2476_s0 + $0x78] sm:$0xff]  ;;  %v56_v32 = vld [vmem:[%s2477_s2] ss:$4 sm:$0x3] }
   0x8   :  { %v51_v28 = vpack.c.bf16 %v43_v27, %v42_v26  ;;  %v1718_v34 = vrot.slane %v56_v32, %v1710_v31  ;;  %v1721_v35 = vrot.slane %v56_v32, %v1715_v33  ;;  %v1518_v15 = vld [vmem:[%s2478_s3 + $0x40] sm:$0xff]   ;;  %v1520_v24 = vld [vmem:[%s2478_s3 + $0x48] sm:$0xff]   ;;  %vm2360_vm3 = vmpackc.low %vm884_vm1, %vm884_vm1 }
   0x9   :  { %1360 = vmatprep.subr.bf16.mxu1 %v1518_v15 }
   0xa   :  { %1314 = vmatmul.mubr.msk.bf16.vlgmr.msra.gmra.mrb[0].mxu0 %vm88_vm0, %v44_v7 }
   0xb   :  { %155 = vmatprep.mubr.bf16.mxu0 %v1598_v1 }
  0x12   :  { %1315 = vmatmul.mubr.msk.bf16.gmra.mrb[4].mxu0 %vm88_vm0, %v45_v10 }
  0x13   :  { %165 = vmatprep.mubr.bf16.mxu0 %v1598_v1 }
  0x1a   :  { %1316 = vmatmul.mubr.msk.bf16.gmra.mrb[8].mxu0 %vm88_vm0, %v46_v13 }
  0x1b   :  { %175 = vmatprep.mubr.bf16.mxu0 %v1598_v1 }
  0x22   :  { %1317 = vmatmul.mubr.msk.bf16.gmra.mrb[12].mxu0 %vm88_vm0, %v47_v16  ;;  %v1519_v16 = vld [vmem:[%s2478_s3] sm:$0xff]  }
  0x23   :  { %185 = vmatprep.mubr.bf16.mxu0 %v1598_v1  ;;  %1361 = vmatpush3.bf16.msra.mxu1 %v1519_v16  ;;  %v1528_v16 = vld [vmem:[%s2478_s3 + $0x68] sm:$0xff]  }
  0x24   :  { %1362 = vmatprep.subr.bf16.mxu1 %v1520_v24 }
  0x2a   :  { %1318 = vmatmul.mubr.msk.bf16.gmra.mrb[16].mxu0 %vm88_vm0, %v48_v19 }
  0x2b   :  { %195 = vmatprep.mubr.bf16.mxu0 %v1598_v1 }
  0x32   :  { %1319 = vmatmul.mubr.msk.bf16.gmra.mrb[20].mxu0 %vm88_vm0, %v49_v22 }
  0x33   :  { %205 = vmatprep.mubr.bf16.mxu0 %v1598_v1 }
  0x3a   :  { %1320 = vmatmul.mubr.msk.bf16.gmra.mrb[24].mxu0 %vm88_vm0, %v50_v25 }
  0x3b   :  { %215 = vmatprep.mubr.bf16.mxu0 %v1598_v1 }
  0x42   :  { %1321 = vmatmul.mubr.msk.bf16.gmra.mrb[28].mxu0 %vm88_vm0, %v51_v28  ;;  %v1521_v28 = vld [vmem:[%s2478_s3 + $0x8] sm:$0xff]  }
  0x43   :  { %1363 = vmatpush3.bf16.msra.mxu1 %v1521_v28 }
  0xdd   :  { %v147_v36 = vpop.f32.mrb[0].mxu0 }
  0xde   :  { %v1724_v37 = vadd.f32 %v147_v36, %v1718_v34  ;;  %v149_v38 = vpop.f32.mrb[1].mxu0 }
  0xdf   :  { %v1727_v39 = vadd.f32 %v149_v38, %v1721_v35  ;;  %v151_v40 = vpop.f32.mrb[2].mxu0 }
  0xe0   :  { %v1730_v41 = vadd.f32 %v151_v40, %v1718_v34  ;;  %v153_v42 = vpop.f32.mrb[3].mxu0  ;;  %v278_v43 = vmul.f32 %v1724_v37, %v1724_v37 }
  0xe1   :  { %v1735_v44 = vadd.f32 %v153_v42, %v1721_v35  ;;  %v230_v45 = vadd.f32 %v1727_v39, %v1724_v37  ;;  %v279_v46 = vmul.f32 %v1727_v39, %v1727_v39  ;;  %v1522_v42 = vld [vmem:[%s2478_s3 + $0x50] sm:$0xff]  }
  0xe2   :  { %v280_v48 = vmul.f32 %v1730_v41, %v1730_v41  ;;  %1364 = vmatprep.subr.bf16.mxu1 %v1522_v42  ;;  %v1531_v42 = vld [vmem:[%s2478_s3 + $0x30] sm:$0xff]  }
  0xe3   :  { %231 = vadd.xlane.f32.xlu0 %v230_v45  ;;  %v310_v47 = vadd.f32 %v279_v46, %v278_v43  ;;  %v281_v49 = vmul.f32 %v1735_v44, %v1735_v44  ;;  %v233_v51 = vadd.f32 %v1735_v44, %v1730_v41 }
  0xe5   :  { %v157_v50 = vpop.f32.mrb[4].mxu0  ;;  %311 = vadd.xlane.f32.xlu1 %v310_v47  ;;  %v313_v56 = vadd.f32 %v281_v49, %v280_v48  ;;  %v1523_v47 = vld [vmem:[%s2478_s3 + $0x10] sm:$0xff]  }
  0xe6   :  { %v1748_v52 = vadd.f32 %v157_v50, %v1718_v34  ;;  %v159_v53 = vpop.f32.mrb[5].mxu0  ;;  %1365 = vmatpush3.bf16.msra.mxu1 %v1523_v47 }
  0xe7   :  { %v1751_v54 = vadd.f32 %v159_v53, %v1721_v35  ;;  %v161_v55 = vpop.f32.mrb[6].mxu0  ;;  %234 = vadd.xlane.f32.xlu0 %v233_v51  ;;  %v1524_v53 = vld [vmem:[%s2478_s3 + $0x58] sm:$0xff]  }
  0xe8   :  { %v1754_v57 = vadd.f32 %v161_v55, %v1718_v34  ;;  %v163_v58 = vpop.f32.mrb[7].mxu0  ;;  %v282_v61 = vmul.f32 %v1748_v52, %v1748_v52  ;;  %1366 = vmatprep.subr.bf16.mxu1 %v1524_v53 }
  0xe9   :  { %v1757_v59 = vadd.f32 %v163_v58, %v1721_v35  ;;  %314 = vadd.xlane.f32.xlu1 %v313_v56  ;;  %v236_v60 = vadd.f32 %v1751_v54, %v1748_v52  ;;  %v283_v62 = vmul.f32 %v1751_v54, %v1751_v54 }
  0xea   :  { %v284_v0 = vmul.f32 %v1754_v57, %v1754_v57 }
  0xeb   :  { %237 = vadd.xlane.f32.xlu0 %v236_v60  ;;  %v239_v63 = vadd.f32 %v1757_v59, %v1754_v57  ;;  %v285_v1 = vmul.f32 %v1757_v59, %v1757_v59  ;;  %v316_v3 = vadd.f32 %v283_v62, %v282_v61  ;;  %v1525_v60 = vld [vmem:[%s2478_s3 + $0x18] sm:$0xff]  }
  0xec   :  { %1367 = vmatpush3.bf16.msra.mxu1 %v1525_v60 }
  0xed   :  { %v167_v2 = vpop.f32.mrb[8].mxu0  ;;  %240 = vadd.xlane.f32.xlu1 %v239_v63  ;;  %v319_v8 = vadd.f32 %v285_v1, %v284_v0 }
  0xee   :  { %v1772_v4 = vadd.f32 %v167_v2, %v1718_v34  ;;  %v169_v5 = vpop.f32.mrb[9].mxu0 }
  0xef   :  { %v1775_v6 = vadd.f32 %v169_v5, %v1721_v35  ;;  %v171_v7 = vpop.f32.mrb[10].mxu0  ;;  %317 = vadd.xlane.f32.xlu0 %v316_v3  ;;  %v1526_v3 = vld [vmem:[%s2478_s3 + $0x60] sm:$0xff]  }
  0xf0   :  { %v1778_v9 = vadd.f32 %v171_v7, %v1718_v34  ;;  %v173_v10 = vpop.f32.mrb[11].mxu0  ;;  %v286_v13 = vmul.f32 %v1772_v4, %v1772_v4  ;;  %1368 = vmatprep.subr.bf16.mxu1 %v1526_v3 }
  0xf1   :  { %v1781_v11 = vadd.f32 %v173_v10, %v1721_v35  ;;  %320 = vadd.xlane.f32.xlu1 %v319_v8  ;;  %v242_v12 = vadd.f32 %v1775_v6, %v1772_v4  ;;  %v287_v14 = vmul.f32 %v1775_v6, %v1775_v6  ;;  %v1527_v10 = vld [vmem:[%s2478_s3 + $0x20] sm:$0xff]  }
  0xf2   :  { %v288_v18 = vmul.f32 %v1778_v9, %v1778_v9  ;;  %1369 = vmatpush3.bf16.msra.mxu1 %v1527_v10 }
  0xf3   :  { %243 = vadd.xlane.f32.xlu0 %v242_v12  ;;  %v245_v17 = vadd.f32 %v1781_v11, %v1778_v9  ;;  %v289_v19 = vmul.f32 %v1781_v11, %v1781_v11  ;;  %v322_v21 = vadd.f32 %v287_v14, %v286_v13  ;;  %1370 = vmatprep.subr.bf16.mxu1 %v1528_v16 }
  0xf5   :  { %v177_v20 = vpop.f32.mrb[12].mxu0  ;;  %246 = vadd.xlane.f32.xlu1 %v245_v17  ;;  %v325_v27 = vadd.f32 %v289_v19, %v288_v18 }
  0xf6   :  { %v1802_v22 = vadd.f32 %v177_v20, %v1718_v34  ;;  %v179_v23 = vpop.f32.mrb[13].mxu0  ;;  %v1529_v20 = vld [vmem:[%s2478_s3 + $0x28] sm:$0xff]  }
  0xf7   :  { %v1808_v25 = vadd.f32 %v179_v23, %v1721_v35  ;;  %v181_v26 = vpop.f32.mrb[14].mxu0  ;;  %323 = vadd.xlane.f32.xlu0 %v322_v21  ;;  %1371 = vmatpush3.bf16.msra.mxu1 %v1529_v20 }
  0xf8   :  { %v1814_v29 = vadd.f32 %v181_v26, %v1718_v34  ;;  %v183_v30 = vpop.f32.mrb[15].mxu0  ;;  %v290_v32 = vmul.f32 %v1802_v22, %v1802_v22 }
  0xf9   :  { %v1819_v36 = vadd.f32 %v183_v30, %v1721_v35  ;;  %326 = vadd.xlane.f32.xlu1 %v325_v27  ;;  %v248_v38 = vadd.f32 %v1808_v25, %v1802_v22  ;;  %v291_v40 = vmul.f32 %v1808_v25, %v1808_v25  ;;  %v1530_v30 = vld [vmem:[%s2478_s3 + $0x70] sm:$0xff]  }
  0xfa   :  { %v292_v45 = vmul.f32 %v1814_v29, %v1814_v29  ;;  %1372 = vmatprep.subr.bf16.mxu1 %v1530_v30 }
  0xfb   :  { %249 = vadd.xlane.f32.xlu0 %v248_v38  ;;  %v251_v43 = vadd.f32 %v1819_v36, %v1814_v29  ;;  %v293_v46 = vmul.f32 %v1819_v36, %v1819_v36  ;;  %v328_v49 = vadd.f32 %v291_v40, %v290_v32  ;;  %1373 = vmatpush3.bf16.msra.mxu1 %v1531_v42 }
  0xfd   :  { %v187_v48 = vpop.f32.mrb[16].mxu0  ;;  %252 = vadd.xlane.f32.xlu1 %v251_v43  ;;  %v331_v58 = vadd.f32 %v293_v46, %v292_v45 }
  0xfe   :  { %v1838_v50 = vadd.f32 %v187_v48, %v1718_v34  ;;  %v189_v51 = vpop.f32.mrb[17].mxu0  ;;  %v1532_v48 = vld [vmem:[%s2478_s3 + $0x78] sm:$0xff]  }
  0xff   :  { %v1844_v55 = vadd.f32 %v189_v51, %v1721_v35  ;;  %v191_v56 = vpop.f32.mrb[18].mxu0  ;;  %329 = vadd.xlane.f32.xlu0 %v328_v49  ;;  %1374 = vmatprep.subr.bf16.mxu1 %v1532_v48 }
 0x100   :  { %v1850_v61 = vadd.f32 %v191_v56, %v1718_v34  ;;  %v193_v62 = vpop.f32.mrb[19].mxu0  ;;  %v294_v63 = vmul.f32 %v1838_v50, %v1838_v50  ;;  %v1533_v56 = vld [vmem:[%s2478_s3 + $0x38] sm:$0xff]  }
 0x101   :  { %v1855_v0 = vadd.f32 %v193_v62, %v1721_v35  ;;  %332 = vadd.xlane.f32.xlu1 %v331_v58  ;;  %v254_v1 = vadd.f32 %v1844_v55, %v1838_v50  ;;  %v295_v2 = vmul.f32 %v1844_v55, %v1844_v55  ;;  %1375 = vmatpush3.bf16.msra.mxu1 %v1533_v56 }
 0x102   :  { %v296_v7 = vmul.f32 %v1850_v61, %v1850_v61 }
 0x103   :  { %255 = vadd.xlane.f32.xlu0 %v254_v1  ;;  %v257_v5 = vadd.f32 %v1855_v0, %v1850_v61  ;;  %v297_v8 = vmul.f32 %v1855_v0, %v1855_v0  ;;  %v334_v13 = vadd.f32 %v295_v2, %v294_v63 }
 0x105   :  { %v197_v12 = vpop.f32.mrb[20].mxu0  ;;  %258 = vadd.xlane.f32.xlu1 %v257_v5  ;;  %v337_v19 = vadd.f32 %v297_v8, %v296_v7 }
 0x106   :  { %v1874_v14 = vadd.f32 %v197_v12, %v1718_v34  ;;  %v199_v15 = vpop.f32.mrb[21].mxu0 }
 0x107   :  { %v1880_v17 = vadd.f32 %v199_v15, %v1721_v35  ;;  %v201_v18 = vpop.f32.mrb[22].mxu0  ;;  %335 = vadd.xlane.f32.xlu0 %v334_v13 }
 0x108   :  { %v1886_v21 = vadd.f32 %v201_v18, %v1718_v34  ;;  %v203_v23 = vpop.f32.mrb[23].mxu0  ;;  %v298_v24 = vmul.f32 %v1874_v14, %v1874_v14 }
 0x109   :  { %v1891_v26 = vadd.f32 %v203_v23, %v1721_v35  ;;  %338 = vadd.xlane.f32.xlu1 %v337_v19  ;;  %v260_v27 = vadd.f32 %v1880_v17, %v1874_v14  ;;  %v299_v28 = vmul.f32 %v1880_v17, %v1880_v17 }
 0x10a   :  { %v300_v38 = vmul.f32 %v1886_v21, %v1886_v21 }
 0x10b   :  { %261 = vadd.xlane.f32.xlu0 %v260_v27  ;;  %v263_v32 = vadd.f32 %v1891_v26, %v1886_v21  ;;  %v301_v40 = vmul.f32 %v1891_v26, %v1891_v26  ;;  %v340_v45 = vadd.f32 %v299_v28, %v298_v24 }
 0x10d   :  { %v207_v43 = vpop.f32.mrb[24].mxu0  ;;  %264 = vadd.xlane.f32.xlu1 %v263_v32  ;;  %v343_v53 = vadd.f32 %v301_v40, %v300_v38 }
 0x10e   :  { %v1910_v46 = vadd.f32 %v207_v43, %v1718_v34  ;;  %v209_v47 = vpop.f32.mrb[25].mxu0 }
 0x10f   :  { %v1916_v49 = vadd.f32 %v209_v47, %v1721_v35  ;;  %v211_v51 = vpop.f32.mrb[26].mxu0  ;;  %341 = vadd.xlane.f32.xlu0 %v340_v45 }
 0x110   :  { %v1922_v58 = vadd.f32 %v211_v51, %v1718_v34  ;;  %v213_v60 = vpop.f32.mrb[27].mxu0  ;;  %v302_v62 = vmul.f32 %v1910_v46, %v1910_v46 }
 0x111   :  { %v1927_v63 = vadd.f32 %v213_v60, %v1721_v35  ;;  %344 = vadd.xlane.f32.xlu1 %v343_v53  ;;  %v266_v1 = vadd.f32 %v1916_v49, %v1910_v46  ;;  %v303_v2 = vmul.f32 %v1916_v49, %v1916_v49 }
 0x112   :  { %v304_v5 = vmul.f32 %v1922_v58, %v1922_v58 }
 0x113   :  { %267 = vadd.xlane.f32.xlu0 %v266_v1  ;;  %v269_v3 = vadd.f32 %v1927_v63, %v1922_v58  ;;  %v305_v7 = vmul.f32 %v1927_v63, %v1927_v63  ;;  %v346_v10 = vadd.f32 %v303_v2, %v302_v62 }
 0x115   :  { %v217_v8 = vpop.f32.mrb[28].mxu0  ;;  %270 = vadd.xlane.f32.xlu1 %v269_v3  ;;  %v349_v18 = vadd.f32 %v305_v7, %v304_v5 }
 0x116   :  { %v1940_v12 = vadd.f32 %v217_v8, %v1718_v34  ;;  %v219_v13 = vpop.f32.mrb[29].mxu0 }
 0x117   :  { %v1943_v15 = vadd.f32 %v219_v13, %v1721_v35  ;;  %v221_v16 = vpop.f32.mrb[30].mxu0  ;;  %347 = vadd.xlane.f32.xlu0 %v346_v10 }
 0x118   :  { %v1946_v19 = vadd.f32 %v221_v16, %v1718_v34  ;;  %v223_v20 = vpop.f32.mrb[31].mxu0  ;;  %v306_v27 = vmul.f32 %v1940_v12, %v1940_v12 }
 0x119   :  { %v1949_v23 = vadd.f32 %v223_v20, %v1721_v35  ;;  %350 = vadd.xlane.f32.xlu1 %v349_v18  ;;  %v272_v24 = vadd.f32 %v1943_v15, %v1940_v12  ;;  %v307_v28 = vmul.f32 %v1943_v15, %v1943_v15 }
 0x11a   :  { %v308_v34 = vmul.f32 %v1946_v19, %v1946_v19 }
 0x11b   :  { %273 = vadd.xlane.f32.xlu0 %v272_v24  ;;  %v275_v30 = vadd.f32 %v1949_v23, %v1946_v19  ;;  %v309_v35 = vmul.f32 %v1949_v23, %v1949_v23  ;;  %v352_v32 = vadd.f32 %v307_v28, %v306_v27 }
 0x11d   :  { %276 = vadd.xlane.f32.xlu1 %v275_v30  ;;  %v355_v38 = vadd.f32 %v309_v35, %v308_v34  ;;  %v1322_v30 = vld [vmem:[%s2477_s2 + $0x1] ss:$4 sm:$0x3] }
 0x11f   :  { %353 = vadd.xlane.f32.xlu0 %v352_v32 }
 0x121   :  { %356 = vadd.xlane.f32.xlu1 %v355_v38 }
 0x170   :  { %v232_v40 = vpop.xlane.xlu0 %231 }
 0x171   :  { %v358_v42 = vmul.f32 0.00390625, %v232_v40 }
 0x172   :  { %v312_v43 = vpop.xlane.xlu1 %311 }
 0x173   :  { %v374_v45 = vmul.f32 0.00390625, %v312_v43  ;;  %v390_v47 = vmul.f32 %v358_v42, %v358_v42  ;;  %v455_v40 = vsub.f32 %v1727_v39, %v358_v42 }
 0x174   :  { %v235_v48 = vpop.xlane.xlu0 %234 }
 0x175   :  { %v406_v51 = vsub.f32 %v374_v45, %v390_v47  ;;  %v1963_v53 = vmul.f32 0.00390625, %v235_v48  ;;  %v1982_v45 = vrot.slane %v1322_v30, %v1715_v33 }
 0x176   :  { %v315_v56 = vpop.xlane.xlu1 %314 }
 0x177   :  { %v422_v60 = vadd.f32 1e-05, %v406_v51  ;;  %v375_v62 = vmul.f32 0.00390625, %v315_v56  ;;  %v391_v1 = vmul.f32 %v1963_v53, %v1963_v53  ;;  %v1323_v51 = vld [vmem:[%s2477_s2 + $0x2] ss:$4 sm:$0x3]  ;;  %v454_v56 = vsub.f32 %v1724_v37, %v358_v42 }
 0x178   :  { %v238_v2 = vpop.xlane.xlu0 %237  ;;  %v2000_v37 = vrot.slane %v1323_v51, %v1715_v33 }
 0x179   :  { %1534 = vrsqrt.f32 %v422_v60  ;;  %v1967_v3 = vmul.f32 0.00390625, %v238_v2  ;;  %v407_v5 = vsub.f32 %v375_v62, %v391_v1 }
 0x17a   :  { %v241_v7 = vpop.xlane.xlu1 %240 }
 0x17b   :  { %v1969_v8 = vmul.f32 0.00390625, %v241_v7  ;;  %v423_v10 = vadd.f32 1e-05, %v407_v5  ;;  %v392_v16 = vmul.f32 %v1967_v3, %v1967_v3  ;;  %v1993_v5 = vrot.slane %v1322_v30, %v1710_v31 }
 0x17c   :  { %v318_v13 = vpop.xlane.xlu0 %317  ;;  %v459_v33 = vsub.f32 %v1751_v54, %v1967_v3 }
 0x17d   :  { %v376_v18 = vmul.f32 0.00390625, %v318_v13  ;;  %1536 = vrsqrt.f32 %v423_v10  ;;  %v393_v27 = vmul.f32 %v1969_v8, %v1969_v8  ;;  %v1997_v13 = vrot.slane %v1323_v51, %v1710_v31 }
 0x17e   :  { %v321_v20 = vpop.xlane.xlu1 %320  ;;  %v458_v31 = vsub.f32 %v1748_v52, %v1967_v3  ;;  %v460_v30 = vsub.f32 %v1754_v57, %v1969_v8 }
 0x17f   :  { %v408_v24 = vsub.f32 %v376_v18, %v392_v16  ;;  %v377_v28 = vmul.f32 0.00390625, %v321_v20  ;;  %v457_v16 = vsub.f32 %v1735_v44, %v1963_v53 }
 0x180   :  { %v244_v34 = vpop.xlane.xlu0 %243 }
 0x181   :  { %v424_v35 = vadd.f32 1e-05, %v408_v24  ;;  %v409_v32 = vsub.f32 %v377_v28, %v393_v27  ;;  %v1978_v38 = vmul.f32 0.00390625, %v244_v34  ;;  %v456_v28 = vsub.f32 %v1730_v41, %v1963_v53 }
 0x182   :  { %v247_v43 = vpop.xlane.xlu1 %246 }
 0x183   :  { %v1535_v47 = vpop.eup %1534  ;;  %1538 = vrsqrt.f32 %v424_v35  ;;  %v425_v48 = vadd.f32 1e-05, %v409_v32  ;;  %v1988_v60 = vmul.f32 0.00390625, %v247_v43  ;;  %v394_v39 = vmul.f32 %v1978_v38, %v1978_v38 }
 0x184   :  { %v324_v62 = vpop.xlane.xlu0 %323  ;;  %v487_v1 = vmul.f32 %v1535_v47, %v455_v40  ;;  %v486_v42 = vmul.f32 %v1535_v47, %v454_v56  ;;  %v461_v43 = vsub.f32 %v1757_v59, %v1969_v8  ;;  %v463_v57 = vsub.f32 %v1775_v6, %v1978_v38 }
 0x185   :  { %1540 = vrsqrt.f32 %v425_v48  ;;  %v378_v2 = vmul.f32 0.00390625, %v324_v62  ;;  %v395_v20 = vmul.f32 %v1988_v60, %v1988_v60  ;;  %v2483_v6 = vsub.f32 %v1772_v4, %v1978_v38 }
 0x186   :  { %v327_v7 = vpop.xlane.xlu1 %326  ;;  %v530_v10 = vmul.f32 %v1982_v45, %v487_v1  ;;  %v529_v52 = vmul.f32 %v1993_v5, %v486_v42  ;;  %v465_v1 = vsub.f32 %v1781_v11, %v1988_v60 }
 0x187   :  { %v410_v18 = vsub.f32 %v378_v2, %v394_v39  ;;  %v379_v24 = vmul.f32 0.00390625, %v327_v7  ;;  %v1537_v27 = vpop.eup %1536 }
 0x188   :  { %v250_v34 = vpop.xlane.xlu0 %249  ;;  %v489_v40 = vmul.f32 %v1537_v27, %v457_v16  ;;  %v573_v41 = vadd.f32 %v2000_v37, %v530_v10  ;;  %v488_v53 = vmul.f32 %v1537_v27, %v456_v28 }
 0x189   :  { %v426_v44 = vadd.f32 1e-05, %v410_v18  ;;  %v411_v35 = vsub.f32 %v379_v24, %v395_v20  ;;  %v2014_v32 = vmul.f32 0.00390625, %v250_v34  ;;  %v572_v18 = vadd.f32 %v1997_v13, %v529_v52 }
 0x18a   :  { %v253_v47 = vpop.xlane.xlu1 %252  ;;  %v532_v8 = vmul.f32 %v1982_v45, %v489_v40  ;;  %v531_v56 = vmul.f32 %v1993_v5, %v488_v53  ;;  %v605_v16 = vmax.f32 %v573_v41, 0.0 }
 0x18b   :  { %1542 = vrsqrt.f32 %v426_v44  ;;  %v427_v3 = vadd.f32 1e-05, %v411_v35  ;;  %v2026_v51 = vmul.f32 0.00390625, %v253_v47  ;;  %v396_v39 = vmul.f32 %v2014_v32, %v2014_v32 }
 0x18c   :  { %v330_v59 = vpop.xlane.xlu0 %329  ;;  %v575_v42 = vadd.f32 %v2000_v37, %v532_v8  ;;  %v574_v28 = vadd.f32 %v1997_v13, %v531_v56  ;;  %v604_v54 = vmax.f32 %v572_v18, 0.0 }
 0x18d   :  { %v1539_v62 = vpop.eup %1538  ;;  %1544 = vrsqrt.f32 %v427_v3  ;;  %v380_v2 = vmul.f32 0.00390625, %v330_v59  ;;  %v397_v7 = vmul.f32 %v2026_v51, %v2026_v51 }
 0x18e   :  { %v333_v10 = vpop.xlane.xlu1 %332  ;;  %v491_v11 = vmul.f32 %v1539_v62, %v459_v33  ;;  %v607_v44 = vmax.f32 %v575_v42, 0.0  ;;  %v490_v40 = vmul.f32 %v1539_v62, %v458_v31  ;;  %v606_v48 = vmax.f32 %v574_v28, 0.0 }
 0x18f   :  { %v1541_v20 = vpop.eup %1540  ;;  %v412_v24 = vsub.f32 %v380_v2, %v396_v39  ;;  %v381_v27 = vmul.f32 0.00390625, %v333_v10  ;;  %v466_v33 = vsub.f32 %v1802_v22, %v2014_v32 }
 0x190   :  { %v256_v34 = vpop.xlane.xlu0 %255  ;;  %v493_v35 = vmul.f32 %v1541_v20, %v461_v43  ;;  %v492_v47 = vmul.f32 %v1541_v20, %v460_v30  ;;  %v637_v41 = vpack.c.bf16 %v607_v44, %v605_v16  ;;  %v534_v52 = vmul.f32 %v1982_v45, %v491_v11 }
 0x191   :  { %v428_v53 = vadd.f32 1e-05, %v412_v24  ;;  %v413_v3 = vsub.f32 %v381_v27, %v397_v7  ;;  %v2039_v59 = vmul.f32 0.00390625, %v256_v34  ;;  %v533_v31 = vmul.f32 %v1993_v5, %v490_v40 }
 0x192   :  { %v259_v8 = vpop.xlane.xlu1 %258  ;;  %v536_v39 = vmul.f32 %v1982_v45, %v493_v35  ;;  %817 = vmatprep.mubr.bf16.mxu1 %v637_v41  ;;  %v636_v43 = vpack.c.bf16 %v606_v48, %v604_v54  ;;  %v577_v7 = vadd.f32 %v2000_v37, %v534_v52  ;;  %v535_v18 = vmul.f32 %v1993_v5, %v492_v47 }
 0x193   :  { %1546 = vrsqrt.f32 %v428_v53  ;;  %v429_v56 = vadd.f32 1e-05, %v413_v3  ;;  %v2046_v30 = vmul.f32 0.00390625, %v259_v8  ;;  %v398_v62 = vmul.f32 %v2039_v59, %v2039_v59 }
 0x194   :  { %v336_v2 = vpop.xlane.xlu0 %335  ;;  %v579_v16 = vadd.f32 %v2000_v37, %v536_v39  ;;  %v467_v20 = vsub.f32 %v1808_v25, %v2014_v32  ;;  %v468_v24 = vsub.f32 %v1814_v29, %v2026_v51  ;;  %818 = vmatmul.mubr.bf16.vlgmr.msra.gmra.mrb[0].mxu1 %v636_v43  ;;  %v609_v27 = vmax.f32 %v577_v7, 0.0 }
 0x195   :  { %v1543_v10 = vpop.eup %1542  ;;  %1548 = vrsqrt.f32 %v429_v56  ;;  %v382_v42 = vmul.f32 0.00390625, %v336_v2  ;;  %v399_v54 = vmul.f32 %v2046_v30, %v2046_v30  ;;  %v576_v35 = vadd.f32 %v1997_v13, %v533_v31 }
 0x196   :  { %v339_v48 = vpop.xlane.xlu1 %338  ;;  %v611_v44 = vmax.f32 %v579_v16, 0.0  ;;  %v469_v40 = vsub.f32 %v1819_v36, %v2026_v51  ;;  %v578_v25 = vadd.f32 %v1997_v13, %v535_v18  ;;  %v495_v53 = vmul.f32 %v1543_v10, %v463_v57 }
 0x197   :  { %v1545_v28 = vpop.eup %1544  ;;  %v414_v11 = vsub.f32 %v382_v42, %v398_v62  ;;  %v383_v34 = vmul.f32 0.00390625, %v339_v48  ;;  %v608_v43 = vmax.f32 %v576_v35, 0.0  ;;  %v470_v2 = vsub.f32 %v1838_v50, %v2039_v59 }
 0x198   :  { %v262_v47 = vpop.xlane.xlu0 %261  ;;  %v497_v3 = vmul.f32 %v1545_v28, %v465_v1  ;;  %v639_v39 = vpack.c.bf16 %v611_v44, %v609_v27  ;;  %v610_v62 = vmax.f32 %v578_v25, 0.0  ;;  %v538_v31 = vmul.f32 %v1982_v45, %v495_v53 }
 0x199   :  { %v430_v8 = vadd.f32 1e-05, %v414_v11  ;;  %v415_v41 = vsub.f32 %v383_v34, %v399_v54  ;;  %v2066_v52 = vmul.f32 0.00390625, %v262_v47  ;;  %v494_v57 = vmul.f32 %v1543_v10, %v2483_v6 }
 0x19a   :  { %v265_v56 = vpop.xlane.xlu1 %264  ;;  %v540_v36 = vmul.f32 %v1982_v45, %v497_v3  ;;  %825 = vmatprep.mubr.bf16.mxu1 %v639_v39  ;;  %v638_v42 = vpack.c.bf16 %v610_v62, %v608_v43  ;;  %v581_v54 = vadd.f32 %v2000_v37, %v538_v31  ;;  %v2484_v34 = vsub.f32 %v1778_v9, %v1988_v60 }
 0x19b   :  { %1550 = vrsqrt.f32 %v430_v8  ;;  %v431_v7 = vadd.f32 1e-05, %v415_v41  ;;  %v2075_v1 = vmul.f32 0.00390625, %v265_v56  ;;  %v400_v16 = vmul.f32 %v2066_v52, %v2066_v52 }
 0x19c   :  { %v342_v18 = vpop.xlane.xlu0 %341  ;;  %v583_v11 = vadd.f32 %v2000_v37, %v540_v36  ;;  %v496_v44 = vmul.f32 %v1545_v28, %v2484_v34  ;;  %v471_v4 = vsub.f32 %v1844_v55, %v2039_v59  ;;  %v472_v38 = vsub.f32 %v1850_v61, %v2046_v30  ;;  %826 = vmatmul.mubr.bf16.gmra.mrb[4].mxu1 %v638_v42 }
 0x19d   :  { %v1547_v48 = vpop.eup %1546  ;;  %1552 = vrsqrt.f32 %v431_v7  ;;  %v384_v27 = vmul.f32 0.00390625, %v342_v18  ;;  %v401_v10 = vmul.f32 %v2075_v1, %v2075_v1  ;;  %v613_v47 = vmax.f32 %v581_v54, 0.0 }
 0x19e   :  { %v345_v35 = vpop.xlane.xlu1 %344  ;;  %v615_v8 = vmax.f32 %v583_v11, 0.0  ;;  %v537_v41 = vmul.f32 %v1993_v5, %v494_v57  ;;  %v473_v9 = vsub.f32 %v1855_v0, %v2046_v30  ;;  %v539_v55 = vmul.f32 %v1993_v5, %v496_v44 }
 0x19f   :  { %v1549_v25 = vpop.eup %1548  ;;  %v416_v53 = vsub.f32 %v384_v27, %v400_v16  ;;  %v385_v3 = vmul.f32 0.00390625, %v345_v35  ;;  %v499_v28 = vmul.f32 %v1547_v48, %v467_v20  ;;  %v474_v0 = vsub.f32 %v1874_v14, %v2066_v52 }
 0x1a0   :  { %v268_v60 = vpop.xlane.xlu0 %267  ;;  %v501_v39 = vmul.f32 %v1549_v25, %v469_v40  ;;  %v641_v31 = vpack.c.bf16 %v615_v8, %v613_v47  ;;  %v580_v7 = vadd.f32 %v1997_v13, %v537_v41  ;;  %v582_v6 = vadd.f32 %v1997_v13, %v539_v55 }
 0x1a1   :  { %v432_v56 = vadd.f32 1e-05, %v416_v53  ;;  %v417_v43 = vsub.f32 %v385_v3, %v401_v10  ;;  %v2094_v62 = vmul.f32 0.00390625, %v268_v60  ;;  %v542_v57 = vmul.f32 %v1982_v45, %v499_v28 }
 0x1a2   :  { %v271_v36 = vpop.xlane.xlu1 %270  ;;  %v544_v42 = vmul.f32 %v1982_v45, %v501_v39  ;;  %833 = vmatprep.mubr.bf16.mxu1 %v641_v31  ;;  %v498_v40 = vmul.f32 %v1547_v48, %v466_v33  ;;  %v612_v18 = vmax.f32 %v580_v7, 0.0  ;;  %v614_v54 = vmax.f32 %v582_v6, 0.0 }
 0x1a3   :  { %1554 = vrsqrt.f32 %v432_v56  ;;  %v433_v20 = vadd.f32 1e-05, %v417_v43  ;;  %v2105_v16 = vmul.f32 0.00390625, %v271_v36  ;;  %v402_v27 = vmul.f32 %v2094_v62, %v2094_v62 }
 0x1a4   :  { %v348_v11 = vpop.xlane.xlu0 %347  ;;  %v585_v10 = vadd.f32 %v2000_v37, %v542_v57  ;;  %v587_v35 = vadd.f32 %v2000_v37, %v544_v42  ;;  %v475_v47 = vsub.f32 %v1880_v17, %v2066_v52  ;;  %v476_v22 = vsub.f32 %v1886_v21, %v2075_v1 }
 0x1a5   :  { %v1551_v34 = vpop.eup %1550  ;;  %1556 = vrsqrt.f32 %v433_v20  ;;  %v386_v44 = vmul.f32 0.00390625, %v348_v11  ;;  %v640_v32 = vpack.c.bf16 %v614_v54, %v612_v18  ;;  %v403_v33 = vmul.f32 %v2105_v16, %v2105_v16 }
 0x1a6   :  { %v351_v48 = vpop.xlane.xlu1 %350  ;;  %v617_v41 = vmax.f32 %v585_v10, 0.0  ;;  %v619_v60 = vmax.f32 %v587_v35, 0.0  ;;  %v500_v28 = vmul.f32 %v1549_v25, %v468_v24  ;;  %v541_v17 = vmul.f32 %v1993_v5, %v498_v40 }
 0x1a7   :  { %v1553_v53 = vpop.eup %1552  ;;  %v418_v3 = vsub.f32 %v386_v44, %v402_v27  ;;  %v387_v8 = vmul.f32 0.00390625, %v351_v48  ;;  %834 = vmatmul.mubr.bf16.gmra.mrb[8].mxu1 %v640_v32  ;;  %v503_v39 = vmul.f32 %v1551_v34, %v471_v4  ;;  %v477_v29 = vsub.f32 %v1891_v26, %v2075_v1 }
 0x1a8   :  { %v274_v55 = vpop.xlane.xlu0 %273  ;;  %v505_v56 = vmul.f32 %v1553_v53, %v473_v9  ;;  %v643_v7 = vpack.c.bf16 %v619_v60, %v617_v41  ;;  %v543_v57 = vmul.f32 %v1993_v5, %v500_v28  ;;  %v584_v42 = vadd.f32 %v1997_v13, %v541_v17 }
 0x1a9   :  { %v434_v43 = vadd.f32 1e-05, %v418_v3  ;;  %v419_v31 = vsub.f32 %v387_v8, %v403_v33  ;;  %v2121_v36 = vmul.f32 0.00390625, %v274_v55  ;;  %v546_v20 = vmul.f32 %v1982_v45, %v503_v39 }
 0x1aa   :  { %v277_v6 = vpop.xlane.xlu1 %276  ;;  %v548_v18 = vmul.f32 %v1982_v45, %v505_v56  ;;  %v478_v51 = vsub.f32 %v1910_v46, %v2094_v62  ;;  %841 = vmatprep.mubr.bf16.mxu1 %v643_v7  ;;  %v479_v4 = vsub.f32 %v1916_v49, %v2094_v62  ;;  %v586_v9 = vadd.f32 %v1997_v13, %v543_v57 }
 0x1ab   :  { %1558 = vrsqrt.f32 %v434_v43  ;;  %v435_v24 = vadd.f32 1e-05, %v419_v31  ;;  %v2133_v25 = vmul.f32 0.00390625, %v277_v6  ;;  %v404_v40 = vmul.f32 %v2121_v36, %v2121_v36 }
 0x1ac   :  { %v354_v54 = vpop.xlane.xlu0 %353  ;;  %v589_v11 = vadd.f32 %v2000_v37, %v546_v20  ;;  %v591_v46 = vadd.f32 %v2000_v37, %v548_v18  ;;  %v480_v44 = vsub.f32 %v1922_v58, %v2105_v16  ;;  %v616_v10 = vmax.f32 %v584_v42, 0.0 }
 0x1ad   :  { %v1555_v27 = vpop.eup %1554  ;;  %1560 = vrsqrt.f32 %v435_v24  ;;  %v388_v26 = vmul.f32 0.00390625, %v354_v54  ;;  %v618_v49 = vmax.f32 %v586_v9, 0.0  ;;  %v405_v62 = vmul.f32 %v2133_v25, %v2133_v25 }
 0x1ae   :  { %v357_v35 = vpop.xlane.xlu1 %356  ;;  %v621_v3 = vmax.f32 %v589_v11, 0.0  ;;  %v623_v8 = vmax.f32 %v591_v46, 0.0  ;;  %v502_v60 = vmul.f32 %v1551_v34, %v470_v2  ;;  %v504_v58 = vmul.f32 %v1553_v53, %v472_v38 }
 0x1af   :  { %v1557_v32 = vpop.eup %1556  ;;  %v420_v33 = vsub.f32 %v388_v26, %v404_v40  ;;  %v389_v48 = vmul.f32 0.00390625, %v357_v35  ;;  %v642_v41 = vpack.c.bf16 %v618_v49, %v616_v10  ;;  %v507_v55 = vmul.f32 %v1555_v27, %v475_v47 }
 0x1b0   :  { %v645_v39 = vpack.c.bf16 %v623_v8, %v621_v3  ;;  %v509_v56 = vmul.f32 %v1557_v32, %v477_v29  ;;  %v545_v43 = vmul.f32 %v1993_v5, %v502_v60  ;;  %v547_v31 = vmul.f32 %v1993_v5, %v504_v58 }
 0x1b1   :  { %v436_v28 = vadd.f32 1e-05, %v420_v33  ;;  %v421_v17 = vsub.f32 %v389_v48, %v405_v62  ;;  %842 = vmatmul.mubr.bf16.gmra.mrb[12].mxu1 %v642_v41  ;;  %v550_v7 = vmul.f32 %v1982_v45, %v507_v55  ;;  %v506_v50 = vmul.f32 %v1555_v27, %v474_v0 }
 0x1b2   :  { %849 = vmatprep.mubr.bf16.mxu1 %v645_v39  ;;  %v552_v61 = vmul.f32 %v1982_v45, %v509_v56  ;;  %v508_v30 = vmul.f32 %v1557_v32, %v476_v22  ;;  %v588_v2 = vadd.f32 %v1997_v13, %v545_v43  ;;  %v590_v38 = vadd.f32 %v1997_v13, %v547_v31 }
 0x1b3   :  { %1562 = vrsqrt.f32 %v436_v28  ;;  %v437_v59 = vadd.f32 1e-05, %v421_v17  ;;  %v593_v34 = vadd.f32 %v2000_v37, %v550_v7  ;;  %v549_v47 = vmul.f32 %v1993_v5, %v506_v50 }
 0x1b4   :  { %v481_v14 = vsub.f32 %v1927_v63, %v2105_v16  ;;  %v595_v52 = vadd.f32 %v2000_v37, %v552_v61  ;;  %v551_v0 = vmul.f32 %v1993_v5, %v508_v30  ;;  %v620_v6 = vmax.f32 %v588_v2, 0.0 }
 0x1b5   :  { %v1559_v53 = vpop.eup %1558  ;;  %1564 = vrsqrt.f32 %v437_v59  ;;  %v622_v21 = vmax.f32 %v590_v38, 0.0  ;;  %v625_v1 = vmax.f32 %v593_v34, 0.0  ;;  %v592_v22 = vadd.f32 %v1997_v13, %v549_v47 }
 0x1b6   :  { %v627_v42 = vmax.f32 %v595_v52, 0.0  ;;  %v594_v20 = vadd.f32 %v1997_v13, %v551_v0  ;;  %v511_v18 = vmul.f32 %v1559_v53, %v479_v4  ;;  %v510_v29 = vmul.f32 %v1559_v53, %v478_v51 }
 0x1b7   :  { %v1561_v57 = vpop.eup %1560  ;;  %v644_v24 = vpack.c.bf16 %v622_v21, %v620_v6  ;;  %v624_v11 = vmax.f32 %v592_v22, 0.0  ;;  %v483_v51 = vsub.f32 %v1943_v15, %v2121_v36  ;;  %v482_v49 = vsub.f32 %v1940_v12, %v2121_v36 }
 0x1b8   :  { %v513_v9 = vmul.f32 %v1561_v57, %v481_v14  ;;  %v512_v40 = vmul.f32 %v1561_v57, %v480_v44  ;;  %v647_v63 = vpack.c.bf16 %v627_v42, %v625_v1  ;;  %v626_v16 = vmax.f32 %v594_v20, 0.0 }
 0x1b9   :  { %v554_v54 = vmul.f32 %v1982_v45, %v511_v18  ;;  %850 = vmatmul.mubr.bf16.gmra.mrb[16].mxu1 %v644_v24  ;;  %v553_v10 = vmul.f32 %v1993_v5, %v510_v29  ;;  %v485_v62 = vsub.f32 %v1949_v23, %v2133_v25  ;;  %v484_v41 = vsub.f32 %v1946_v19, %v2133_v25 }
 0x1ba   :  { %v556_v27 = vmul.f32 %v1982_v45, %v513_v9  ;;  %v555_v26 = vmul.f32 %v1993_v5, %v512_v40  ;;  %857 = vmatprep.mubr.bf16.mxu1 %v647_v63  ;;  %v646_v35 = vpack.c.bf16 %v626_v16, %v624_v11 }
 0x1bb   :  { %v597_v46 = vadd.f32 %v2000_v37, %v554_v54  ;;  %v596_v15 = vadd.f32 %v1997_v13, %v553_v10 }
 0x1bc   :  { %v599_v4 = vadd.f32 %v2000_v37, %v556_v27  ;;  %v598_v48 = vadd.f32 %v1997_v13, %v555_v26 }
 0x1bd   :  { %v1563_v44 = vpop.eup %1562  ;;  %v629_v32 = vmax.f32 %v597_v46, 0.0  ;;  %v628_v56 = vmax.f32 %v596_v15, 0.0 }
 0x1be   :  { %v631_v33 = vmax.f32 %v599_v4, 0.0  ;;  %v515_v3 = vmul.f32 %v1563_v44, %v483_v51  ;;  %v514_v12 = vmul.f32 %v1563_v44, %v482_v49  ;;  %v630_v23 = vmax.f32 %v598_v48, 0.0 }
 0x1bf   :  { %v1565_v8 = vpop.eup %1564 }
 0x1c0   :  { %v649_v60 = vpack.c.bf16 %v631_v33, %v629_v32  ;;  %v517_v58 = vmul.f32 %v1565_v8, %v485_v62  ;;  %v558_v55 = vmul.f32 %v1982_v45, %v515_v3  ;;  %v516_v36 = vmul.f32 %v1565_v8, %v484_v41 }
 0x1c1   :  { %858 = vmatmul.mubr.bf16.gmra.mrb[20].mxu1 %v646_v35  ;;  %v557_v25 = vmul.f32 %v1993_v5, %v514_v12  ;;  %v648_v43 = vpack.c.bf16 %v630_v23, %v628_v56 }
 0x1c2   :  { %v560_v28 = vmul.f32 %v1982_v45, %v517_v58  ;;  %v601_v17 = vadd.f32 %v2000_v37, %v558_v55  ;;  %865 = vmatprep.mubr.bf16.mxu1 %v649_v60  ;;  %v559_v39 = vmul.f32 %v1993_v5, %v516_v36 }
 0x1c3   :  { %v600_v61 = vadd.f32 %v1997_v13, %v557_v25 }
 0x1c4   :  { %v603_v19 = vadd.f32 %v2000_v37, %v560_v28  ;;  %v633_v31 = vmax.f32 %v601_v17, 0.0  ;;  %v602_v50 = vadd.f32 %v1997_v13, %v559_v39  ;;  %v2197_v37 = vld [vmem:[%s2479_s4] ss:$0 sm:$0xff] }
 0x1c5   :  { %v632_v30 = vmax.f32 %v600_v61, 0.0 }
 0x1c6   :  { %v635_v7 = vmax.f32 %v603_v19, 0.0  ;;  %v634_v45 = vmax.f32 %v602_v50, 0.0 }
 0x1c8   :  { %v651_v59 = vpack.c.bf16 %v635_v7, %v633_v31  ;;  %v650_v2 = vpack.c.bf16 %v634_v45, %v632_v30 }
 0x1c9   :  { %866 = vmatmul.mubr.bf16.gmra.mrb[24].mxu1 %v648_v43 }
 0x1ca   :  { %873 = vmatprep.mubr.bf16.mxu1 %v651_v59 }
 0x1d1   :  { %874 = vmatmul.mubr.bf16.gmra.mrb[28].mxu1 %v650_v2 }
 0x267   :  { %v1376_v38 = vpop.f32.mrb[0].mxu1 }
 0x268   :  { %v1377_v5 = vpop.f32.mrb[1].mxu1 }
 0x269   :  { %v1378_v34 = vadd.f32 %v1377_v5, %v1376_v38  ;;  %v1379_v47 = vpop.f32.mrb[2].mxu1 }
 0x26a   :  { %v1380_v53 = vpop.f32.mrb[3].mxu1 }
 0x26b   :  { %v2200_v14 = vadd.f32 %v1378_v34, %v2197_v37  ;;  %v1381_v13 = vadd.f32 %v1380_v53, %v1379_v47 }
 0x26d   :  { %v2203_v52 = vadd.f32 %v1381_v13, %v2197_v37  ;;  %v885_v0 = vsel %vm884_vm1, %v2200_v14, 0.0  ;;  %v933_v6 = vmul.f32 %v2200_v14, %v2200_v14 }
 0x26e   :  { %886 = vadd.xlane.f32.xlu0 %v885_v0 }
 0x26f   :  { %v1382_v21 = vpop.f32.mrb[4].mxu1  ;;  %v888_v1 = vsel %vm884_vm1, %v2203_v52, 0.0  ;;  %v934_v22 = vmul.f32 %v2203_v52, %v2203_v52  ;;  %v949_v18 = vsel %vm884_vm1, %v933_v6, 0.0 }
 0x270   :  { %889 = vadd.xlane.f32.xlu1 %v888_v1  ;;  %v1383_v57 = vpop.f32.mrb[5].mxu1 }
 0x271   :  { %v1384_v42 = vadd.f32 %v1383_v57, %v1382_v21  ;;  %v1385_v20 = vpop.f32.mrb[6].mxu1  ;;  %v952_v40 = vsel %vm884_vm1, %v934_v22, 0.0 }
 0x272   :  { %950 = vadd.xlane.f32.xlu0 %v949_v18  ;;  %v1386_v29 = vpop.f32.mrb[7].mxu1 }
 0x273   :  { %v2215_v24 = vadd.f32 %v1384_v42, %v2197_v37  ;;  %v1387_v9 = vadd.f32 %v1386_v29, %v1385_v20 }
 0x274   :  { %953 = vadd.xlane.f32.xlu1 %v952_v40 }
 0x275   :  { %v2219_v63 = vadd.f32 %v1387_v9, %v2197_v37  ;;  %v891_v16 = vsel %vm884_vm1, %v2215_v24, 0.0  ;;  %v935_v54 = vmul.f32 %v2215_v24, %v2215_v24 }
 0x276   :  { %892 = vadd.xlane.f32.xlu0 %v891_v16 }
 0x277   :  { %v894_v27 = vsel %vm884_vm1, %v2219_v63, 0.0  ;;  %v936_v26 = vmul.f32 %v2219_v63, %v2219_v63  ;;  %v955_v46 = vsel %vm884_vm1, %v935_v54, 0.0 }
 0x278   :  { %895 = vadd.xlane.f32.xlu1 %v894_v27 }
 0x279   :  { %v958_v44 = vsel %vm884_vm1, %v936_v26, 0.0 }
 0x27a   :  { %v1388_v11 = vpop.f32.mrb[8].mxu1  ;;  %956 = vadd.xlane.f32.xlu0 %v955_v46 }
 0x27b   :  { %v1389_v10 = vpop.f32.mrb[9].mxu1 }
 0x27c   :  { %v1390_v51 = vadd.f32 %v1389_v10, %v1388_v11  ;;  %v1391_v4 = vpop.f32.mrb[10].mxu1  ;;  %959 = vadd.xlane.f32.xlu1 %v958_v44 }
 0x27d   :  { %v1392_v49 = vpop.f32.mrb[11].mxu1 }
 0x27e   :  { %v2232_v62 = vadd.f32 %v1390_v51, %v2197_v37  ;;  %v1393_v35 = vadd.f32 %v1392_v49, %v1391_v4 }
 0x280   :  { %v2235_v32 = vadd.f32 %v1393_v35, %v2197_v37  ;;  %v897_v33 = vsel %vm884_vm1, %v2232_v62, 0.0  ;;  %v937_v48 = vmul.f32 %v2232_v62, %v2232_v62 }
 0x281   :  { %898 = vadd.xlane.f32.xlu0 %v897_v33 }
 0x282   :  { %v900_v3 = vsel %vm884_vm1, %v2235_v32, 0.0  ;;  %v938_v8 = vmul.f32 %v2235_v32, %v2235_v32  ;;  %v961_v15 = vsel %vm884_vm1, %v937_v48, 0.0 }
 0x283   :  { %901 = vadd.xlane.f32.xlu1 %v900_v3 }
 0x284   :  { %v1394_v41 = vpop.f32.mrb[12].mxu1  ;;  %v964_v12 = vsel %vm884_vm1, %v938_v8, 0.0 }
 0x285   :  { %v1395_v60 = vpop.f32.mrb[13].mxu1  ;;  %962 = vadd.xlane.f32.xlu0 %v961_v15 }
 0x286   :  { %v1396_v58 = vadd.f32 %v1395_v60, %v1394_v41  ;;  %v1397_v55 = vpop.f32.mrb[14].mxu1  ;;  %v1599_v41 = vmov 0.0|0.0  }
 0x287   :  { %v1398_v36 = vpop.f32.mrb[15].mxu1  ;;  %965 = vadd.xlane.f32.xlu1 %v964_v12  ;;  %1476 = vmatprep.subr.bf16.mxu0 %v1599_v41 }
 0x288   :  { %v2248_v23 = vadd.f32 %v1396_v58, %v2197_v37  ;;  %v1399_v28 = vadd.f32 %v1398_v36, %v1397_v55 }
 0x28a   :  { %v2251_v17 = vadd.f32 %v1399_v28, %v2197_v37  ;;  %v903_v39 = vsel %vm884_vm1, %v2248_v23, 0.0  ;;  %v939_v56 = vmul.f32 %v2248_v23, %v2248_v23 }
 0x28b   :  { %904 = vadd.xlane.f32.xlu0 %v903_v39 }
 0x28c   :  { %v1400_v19 = vpop.f32.mrb[16].mxu1  ;;  %v906_v25 = vsel %vm884_vm1, %v2251_v17, 0.0  ;;  %v940_v43 = vmul.f32 %v2251_v17, %v2251_v17  ;;  %v967_v59 = vsel %vm884_vm1, %v939_v56, 0.0 }
 0x28d   :  { %907 = vadd.xlane.f32.xlu1 %v906_v25  ;;  %v1401_v31 = vpop.f32.mrb[17].mxu1 }
 0x28e   :  { %v1402_v7 = vadd.f32 %v1401_v31, %v1400_v19  ;;  %v1403_v50 = vpop.f32.mrb[18].mxu1  ;;  %v970_v2 = vsel %vm884_vm1, %v940_v43, 0.0 }
 0x28f   :  { %968 = vadd.xlane.f32.xlu0 %v967_v59  ;;  %v1404_v61 = vpop.f32.mrb[19].mxu1 }
 0x290   :  { %v2263_v45 = vadd.f32 %v1402_v7, %v2197_v37  ;;  %v1405_v30 = vadd.f32 %v1404_v61, %v1403_v50  ;;  %v1601_v50 = vmov 0.0  }
 0x291   :  { %971 = vadd.xlane.f32.xlu1 %v970_v2  ;;  %1473 = vmatprep.mubr.msk.f32.mxu0 %vm1600_vm2, %v1601_v50 }
 0x292   :  { %v2267_v38 = vadd.f32 %v1405_v30, %v2197_v37  ;;  %v909_v5 = vsel %vm884_vm1, %v2263_v45, 0.0  ;;  %v941_v34 = vmul.f32 %v2263_v45, %v2263_v45 }
 0x293   :  { %910 = vadd.xlane.f32.xlu0 %v909_v5 }
 0x294   :  { %v1406_v47 = vpop.f32.mrb[20].mxu1  ;;  %v912_v53 = vsel %vm884_vm1, %v2267_v38, 0.0  ;;  %v942_v13 = vmul.f32 %v2267_v38, %v2267_v38  ;;  %v973_v1 = vsel %vm884_vm1, %v941_v34, 0.0 }
 0x295   :  { %913 = vadd.xlane.f32.xlu1 %v912_v53  ;;  %v1407_v0 = vpop.f32.mrb[21].mxu1 }
 0x296   :  { %v1408_v6 = vadd.f32 %v1407_v0, %v1406_v47  ;;  %v1409_v21 = vpop.f32.mrb[22].mxu1  ;;  %v976_v20 = vsel %vm884_vm1, %v942_v13, 0.0 }
 0x297   :  { %974 = vadd.xlane.f32.xlu0 %v973_v1  ;;  %v1410_v22 = vpop.f32.mrb[23].mxu1 }
 0x298   :  { %v2279_v57 = vadd.f32 %v1408_v6, %v2197_v37  ;;  %v1411_v42 = vadd.f32 %v1410_v22, %v1409_v21 }
 0x299   :  { %977 = vadd.xlane.f32.xlu1 %v976_v20 }
 0x29a   :  { %v2283_v18 = vadd.f32 %v1411_v42, %v2197_v37  ;;  %v915_v29 = vsel %vm884_vm1, %v2279_v57, 0.0  ;;  %v943_v9 = vmul.f32 %v2279_v57, %v2279_v57 }
 0x29b   :  { %916 = vadd.xlane.f32.xlu0 %v915_v29 }
 0x29c   :  { %v1412_v40 = vpop.f32.mrb[24].mxu1  ;;  %v918_v16 = vsel %vm884_vm1, %v2283_v18, 0.0  ;;  %v944_v54 = vmul.f32 %v2283_v18, %v2283_v18  ;;  %v979_v46 = vsel %vm884_vm1, %v943_v9, 0.0 }
 0x29d   :  { %919 = vadd.xlane.f32.xlu1 %v918_v16  ;;  %v1413_v27 = vpop.f32.mrb[25].mxu1 }
 0x29e   :  { %v1414_v26 = vadd.f32 %v1413_v27, %v1412_v40  ;;  %v1415_v11 = vpop.f32.mrb[26].mxu1  ;;  %v982_v44 = vsel %vm884_vm1, %v944_v54, 0.0 }
 0x29f   :  { %980 = vadd.xlane.f32.xlu0 %v979_v46  ;;  %v1416_v10 = vpop.f32.mrb[27].mxu1 }
 0x2a0   :  { %v2295_v51 = vadd.f32 %v1414_v26, %v2197_v37  ;;  %v1417_v4 = vadd.f32 %v1416_v10, %v1415_v11 }
 0x2a1   :  { %983 = vadd.xlane.f32.xlu1 %v982_v44 }
 0x2a2   :  { %v2299_v49 = vadd.f32 %v1417_v4, %v2197_v37  ;;  %v921_v35 = vsel %vm884_vm1, %v2295_v51, 0.0  ;;  %v945_v33 = vmul.f32 %v2295_v51, %v2295_v51 }
 0x2a3   :  { %922 = vadd.xlane.f32.xlu0 %v921_v35 }
 0x2a4   :  { %v1418_v48 = vpop.f32.mrb[28].mxu1  ;;  %v924_v3 = vsel %vm884_vm1, %v2299_v49, 0.0  ;;  %v946_v8 = vmul.f32 %v2299_v49, %v2299_v49  ;;  %v985_v55 = vsel %vm884_vm1, %v945_v33, 0.0 }
 0x2a5   :  { %925 = vadd.xlane.f32.xlu1 %v924_v3  ;;  %v1419_v15 = vpop.f32.mrb[29].mxu1 }
 0x2a6   :  { %v1420_v60 = vadd.f32 %v1419_v15, %v1418_v48  ;;  %v1421_v58 = vpop.f32.mrb[30].mxu1  ;;  %v988_v39 = vsel %vm884_vm1, %v946_v8, 0.0  ;;  %v2334_v15 = vld [vmem:[%s2479_s4 + $0x1] ss:$0 sm:$0xff] }
 0x2a7   :  { %986 = vadd.xlane.f32.xlu0 %v985_v55  ;;  %v1422_v12 = vpop.f32.mrb[31].mxu1 }
 0x2a8   :  { %v2312_v36 = vadd.f32 %v1420_v60, %v2197_v37  ;;  %v1423_v28 = vadd.f32 %v1422_v12, %v1421_v58 }
 0x2a9   :  { %989 = vadd.xlane.f32.xlu1 %v988_v39  ;;  %v2342_v39 = vld [vmem:[%s2479_s4 + $0x2] ss:$0 sm:$0xff] }
 0x2aa   :  { %v2316_v56 = vadd.f32 %v1423_v28, %v2197_v37  ;;  %v927_v19 = vsel %vm884_vm1, %v2312_v36, 0.0  ;;  %v947_v25 = vmul.f32 %v2312_v36, %v2312_v36 }
 0x2ab   :  { %928 = vadd.xlane.f32.xlu0 %v927_v19 }
 0x2ac   :  { %v930_v43 = vsel %vm884_vm1, %v2316_v56, 0.0  ;;  %v948_v31 = vmul.f32 %v2316_v56, %v2316_v56  ;;  %v991_v7 = vsel %vm884_vm1, %v947_v25, 0.0 }
 0x2ad   :  { %931 = vadd.xlane.f32.xlu1 %v930_v43 }
 0x2ae   :  { %v994_v37 = vsel %vm884_vm1, %v948_v31, 0.0 }
 0x2af   :  { %992 = vadd.xlane.f32.xlu0 %v991_v7 }
 0x2b1   :  { %995 = vadd.xlane.f32.xlu1 %v994_v37 }
 0x2fb   :  { %v887_v59 = vpop.xlane.xlu0 %886 }
 0x2fc   :  { %v997_v61 = vmul.f32 0.015625, %v887_v59 }
 0x2fd   :  { %v890_v30 = vpop.xlane.xlu1 %889 }
 0x2fe   :  { %v998_v2 = vmul.f32 0.015625, %v890_v30  ;;  %v1029_v34 = vmul.f32 %v997_v61, %v997_v61  ;;  %v1093_v48 = vsub.f32 %v2200_v14, %v997_v61 }
 0x2ff   :  { %v951_v5 = vpop.xlane.xlu0 %950 }
 0x300   :  { %v1013_v47 = vmul.f32 0.015625, %v951_v5  ;;  %v1030_v13 = vmul.f32 %v998_v2, %v998_v2  ;;  %v1094_v58 = vsub.f32 %v2203_v52, %v998_v2 }
 0x301   :  { %v954_v53 = vpop.xlane.xlu1 %953 }
 0x302   :  { %v1045_v0 = vsub.f32 %v1013_v47, %v1029_v34  ;;  %v1014_v6 = vmul.f32 0.015625, %v954_v53 }
 0x303   :  { %v893_v21 = vpop.xlane.xlu0 %892 }
 0x304   :  { %v1061_v1 = vadd.f32 1e-05, %v1045_v0  ;;  %v1046_v22 = vsub.f32 %v1014_v6, %v1030_v13  ;;  %v999_v42 = vmul.f32 0.015625, %v893_v21 }
 0x305   :  { %v896_v20 = vpop.xlane.xlu1 %895 }
 0x306   :  { %1566 = vrsqrt.f32 %v1061_v1  ;;  %v1062_v29 = vadd.f32 1e-05, %v1046_v22  ;;  %v1000_v9 = vmul.f32 0.015625, %v896_v20  ;;  %v1031_v16 = vmul.f32 %v999_v42, %v999_v42 }
 0x307   :  { %v957_v40 = vpop.xlane.xlu0 %956  ;;  %v1095_v2 = vsub.f32 %v2215_v24, %v999_v42 }
 0x308   :  { %1568 = vrsqrt.f32 %v1062_v29  ;;  %v1015_v54 = vmul.f32 0.015625, %v957_v40  ;;  %v1032_v26 = vmul.f32 %v1000_v9, %v1000_v9  ;;  %v1096_v0 = vsub.f32 %v2219_v63, %v1000_v9 }
 0x309   :  { %v960_v27 = vpop.xlane.xlu1 %959 }
 0x30a   :  { %v1047_v11 = vsub.f32 %v1015_v54, %v1031_v16  ;;  %v1016_v46 = vmul.f32 0.015625, %v960_v27 }
 0x30c   :  { %v1063_v10 = vadd.f32 1e-05, %v1047_v11  ;;  %v1048_v4 = vsub.f32 %v1016_v46, %v1032_v26 }
 0x30e   :  { %v899_v44 = vpop.xlane.xlu0 %898  ;;  %1570 = vrsqrt.f32 %v1063_v10  ;;  %v1064_v35 = vadd.f32 1e-05, %v1048_v4 }
 0x30f   :  { %v2328_v33 = vmul.f32 0.015625, %v899_v44 }
 0x310   :  { %v902_v3 = vpop.xlane.xlu1 %901  ;;  %v1567_v8 = vpop.eup %1566  ;;  %1572 = vrsqrt.f32 %v1064_v35 }
 0x311   :  { %v2336_v60 = vmul.f32 0.015625, %v902_v3  ;;  %v1109_v55 = vmul.f32 %v1567_v8, %v1093_v48  ;;  %v1033_v14 = vmul.f32 %v2328_v33, %v2328_v33 }
 0x312   :  { %v963_v12 = vpop.xlane.xlu0 %962  ;;  %v1569_v28 = vpop.eup %1568 }
 0x313   :  { %v1017_v19 = vmul.f32 0.015625, %v963_v12  ;;  %v1110_v25 = vmul.f32 %v1569_v28, %v1094_v58  ;;  %v1129_v31 = vmul.f32 %v2334_v15, %v1109_v55  ;;  %v1034_v7 = vmul.f32 %v2336_v60, %v2336_v60 }
 0x314   :  { %v966_v43 = vpop.xlane.xlu1 %965  ;;  %v1097_v58 = vsub.f32 %v2232_v62, %v2328_v33 }
 0x315   :  { %v1049_v52 = vsub.f32 %v1017_v19, %v1033_v14  ;;  %v1018_v37 = vmul.f32 0.015625, %v966_v43  ;;  %v1130_v50 = vmul.f32 %v2334_v15, %v1110_v25  ;;  %v1149_v59 = vadd.f32 %v2342_v39, %v1129_v31 }
 0x316   :  { %v1098_v25 = vsub.f32 %v2235_v32, %v2336_v60 }
 0x317   :  { %v1065_v61 = vadd.f32 1e-05, %v1049_v52  ;;  %v1050_v30 = vsub.f32 %v1018_v37, %v1034_v7  ;;  %v1150_v34 = vadd.f32 %v2342_v39, %v1130_v50  ;;  %v1165_v1 = vmax.f32 %v1149_v59, 0.0 }
 0x318   :  { %v905_v5 = vpop.xlane.xlu0 %904  ;;  %v1571_v47 = vpop.eup %1570 }
 0x319   :  { %1574 = vrsqrt.f32 %v1065_v61  ;;  %v1066_v53 = vadd.f32 1e-05, %v1050_v30  ;;  %v2353_v13 = vmul.f32 0.015625, %v905_v5  ;;  %v1111_v6 = vmul.f32 %v1571_v47, %v1095_v2 }
 0x31a   :  { %v908_v21 = vpop.xlane.xlu1 %907  ;;  %v1166_v22 = vmax.f32 %v1150_v34, 0.0  ;;  %v1573_v20 = vpop.eup %1572 }
 0x31b   :  { %1576 = vrsqrt.f32 %v1066_v53  ;;  %v2356_v29 = vmul.f32 0.015625, %v908_v21  ;;  %v1112_v42 = vmul.f32 %v1573_v20, %v1096_v0  ;;  %v1131_v54 = vmul.f32 %v2334_v15, %v1111_v6 }
 0x31c   :  { %v969_v40 = vpop.xlane.xlu0 %968  ;;  %v1477_v16 = vpack.c.bf16 %v1166_v22, %v1165_v1  ;;  %v1035_v63 = vmul.f32 %v2353_v13, %v2353_v13  ;;  %v1099_v22 = vsub.f32 %v2248_v23, %v2353_v13 }
 0x31d   :  { %v1019_v9 = vmul.f32 0.015625, %v969_v40  ;;  %v1132_v26 = vmul.f32 %v2334_v15, %v1112_v42  ;;  %v1151_v11 = vadd.f32 %v2342_v39, %v1131_v54  ;;  %v1036_v46 = vmul.f32 %v2356_v29, %v2356_v29 }
 0x31e   :  { %v972_v27 = vpop.xlane.xlu1 %971  ;;  %1479 = vmatpush3.bf16.xpose.msk.msra.mxu0 %vm2360_vm3, %v1477_v16 }
 0x31f   :  { %v1051_v10 = vsub.f32 %v1019_v9, %v1035_v63  ;;  %v1020_v4 = vmul.f32 0.015625, %v972_v27  ;;  %1480 = vmatprep.subr.bf16.mxu0 %v1599_v41  ;;  %v1152_v35 = vadd.f32 %v2342_v39, %v1132_v26  ;;  %v1167_v12 = vmax.f32 %v1151_v11, 0.0 }
 0x320   :  { %v911_v44 = vpop.xlane.xlu0 %910  ;;  %v1100_v27 = vsub.f32 %v2251_v17, %v2356_v29 }
 0x321   :  { %v1067_v48 = vadd.f32 1e-05, %v1051_v10  ;;  %v1052_v3 = vsub.f32 %v1020_v4, %v1036_v46  ;;  %v2375_v8 = vmul.f32 0.015625, %v911_v44  ;;  %v1168_v28 = vmax.f32 %v1152_v35, 0.0 }
 0x322   :  { %v914_v55 = vpop.xlane.xlu1 %913 }
 0x323   :  { %v1575_v14 = vpop.eup %1574  ;;  %1578 = vrsqrt.f32 %v1067_v48  ;;  %v1068_v19 = vadd.f32 1e-05, %v1052_v3  ;;  %v2381_v31 = vmul.f32 0.015625, %v914_v55  ;;  %v1481_v52 = vpack.c.bf16 %v1168_v28, %v1167_v12 }
 0x324   :  { %v1113_v43 = vmul.f32 %v1575_v14, %v1097_v58  ;;  %v975_v7 = vpop.xlane.xlu0 %974  ;;  %v1037_v50 = vmul.f32 %v2375_v8, %v2375_v8  ;;  %v1101_v14 = vsub.f32 %v2263_v45, %v2375_v8 }
 0x325   :  { %v1577_v37 = vpop.eup %1576  ;;  %1580 = vrsqrt.f32 %v1068_v19  ;;  %v1021_v62 = vmul.f32 0.015625, %v975_v7  ;;  %v1038_v32 = vmul.f32 %v2381_v31, %v2381_v31 }
 0x326   :  { %v1114_v33 = vmul.f32 %v1577_v37, %v1098_v25  ;;  %v978_v59 = vpop.xlane.xlu1 %977  ;;  %1483 = vmatpush3.bf16.xpose.msk.msra.mxu0 %vm2360_vm3, %v1481_v52  ;;  %v1133_v61 = vmul.f32 %v2334_v15, %v1113_v43 }
 0x327   :  { %v1053_v60 = vsub.f32 %v1021_v62, %v1037_v50  ;;  %v1022_v30 = vmul.f32 0.015625, %v978_v59  ;;  %1484 = vmatprep.subr.bf16.mxu0 %v1599_v41  ;;  %v1102_v50 = vsub.f32 %v2267_v38, %v2381_v31 }
 0x328   :  { %v917_v2 = vpop.xlane.xlu0 %916  ;;  %v1134_v5 = vmul.f32 %v2334_v15, %v1114_v33  ;;  %v1153_v34 = vadd.f32 %v2342_v39, %v1133_v61 }
 0x329   :  { %v1069_v47 = vadd.f32 1e-05, %v1053_v60  ;;  %v1054_v53 = vsub.f32 %v1022_v30, %v1038_v32  ;;  %v2393_v0 = vmul.f32 0.015625, %v917_v2 }
 0x32a   :  { %v920_v6 = vpop.xlane.xlu1 %919  ;;  %v1154_v21 = vadd.f32 %v2342_v39, %v1134_v5  ;;  %v1169_v40 = vmax.f32 %v1153_v34, 0.0 }
 0x32b   :  { %1582 = vrsqrt.f32 %v1069_v47  ;;  %v1070_v1 = vadd.f32 1e-05, %v1054_v53  ;;  %v2398_v20 = vmul.f32 0.015625, %v920_v6  ;;  %v1039_v63 = vmul.f32 %v2393_v0, %v2393_v0 }
 0x32c   :  { %v981_v42 = vpop.xlane.xlu0 %980  ;;  %v1170_v16 = vmax.f32 %v1154_v21, 0.0 }
 0x32d   :  { %v1579_v54 = vpop.eup %1578  ;;  %1584 = vrsqrt.f32 %v1070_v1  ;;  %v1023_v9 = vmul.f32 0.015625, %v981_v42  ;;  %v1040_v23 = vmul.f32 %v2398_v20, %v2398_v20 }
 0x32e   :  { %v1115_v26 = vmul.f32 %v1579_v54, %v1099_v22  ;;  %v984_v11 = vpop.xlane.xlu1 %983  ;;  %v1485_v46 = vpack.c.bf16 %v1170_v16, %v1169_v40  ;;  %v1103_v22 = vsub.f32 %v2279_v57, %v2393_v0 }
 0x32f   :  { %v1581_v10 = vpop.eup %1580  ;;  %v1055_v13 = vsub.f32 %v1023_v9, %v1039_v63  ;;  %v1024_v4 = vmul.f32 0.015625, %v984_v11 }
 0x330   :  { %v1116_v44 = vmul.f32 %v1581_v10, %v1100_v27  ;;  %v923_v35 = vpop.xlane.xlu0 %922  ;;  %1487 = vmatpush3.bf16.xpose.msk.msra.mxu0 %vm2360_vm3, %v1485_v46  ;;  %v1135_v48 = vmul.f32 %v2334_v15, %v1115_v26  ;;  %v1104_v27 = vsub.f32 %v2283_v18, %v2398_v20 }
 0x331   :  { %v1071_v3 = vadd.f32 1e-05, %v1055_v13  ;;  %v1056_v58 = vsub.f32 %v1024_v4, %v1040_v23  ;;  %v2409_v55 = vmul.f32 0.015625, %v923_v35  ;;  %1488 = vmatprep.subr.bf16.mxu0 %v1599_v41 }
 0x332   :  { %v926_v17 = vpop.xlane.xlu1 %925  ;;  %v1136_v29 = vmul.f32 %v2334_v15, %v1116_v44  ;;  %v1155_v12 = vadd.f32 %v2342_v39, %v1135_v48 }
 0x333   :  { %1586 = vrsqrt.f32 %v1071_v3  ;;  %v1072_v28 = vadd.f32 1e-05, %v1056_v58  ;;  %v2416_v19 = vmul.f32 0.015625, %v926_v17  ;;  %v1041_v52 = vmul.f32 %v2409_v55, %v2409_v55 }
 0x334   :  { %v987_v25 = vpop.xlane.xlu0 %986  ;;  %v1156_v43 = vadd.f32 %v2342_v39, %v1136_v29  ;;  %v1171_v59 = vmax.f32 %v1155_v12, 0.0  ;;  %v1105_v17 = vsub.f32 %v2295_v51, %v2409_v55 }
 0x335   :  { %v1583_v7 = vpop.eup %1582  ;;  %1588 = vrsqrt.f32 %v1072_v28  ;;  %v1025_v37 = vmul.f32 0.015625, %v987_v25  ;;  %v1042_v45 = vmul.f32 %v2416_v19, %v2416_v19  ;;  %v1106_v28 = vsub.f32 %v2299_v49, %v2416_v19 }
 0x336   :  { %v1117_v62 = vmul.f32 %v1583_v7, %v1101_v14  ;;  %v990_v33 = vpop.xlane.xlu1 %989  ;;  %v1172_v61 = vmax.f32 %v1156_v43, 0.0 }
 0x337   :  { %v1585_v32 = vpop.eup %1584  ;;  %v1057_v8 = vsub.f32 %v1025_v37, %v1041_v52  ;;  %v1026_v60 = vmul.f32 0.015625, %v990_v33 }
 0x338   :  { %v1118_v30 = vmul.f32 %v1585_v32, %v1102_v50  ;;  %v929_v2 = vpop.xlane.xlu0 %928  ;;  %v1489_v5 = vpack.c.bf16 %v1172_v61, %v1171_v59  ;;  %v1137_v34 = vmul.f32 %v2334_v15, %v1117_v62 }
 0x339   :  { %v1073_v47 = vadd.f32 1e-05, %v1057_v8  ;;  %v1058_v53 = vsub.f32 %v1026_v60, %v1042_v45  ;;  %v1011_v6 = vmul.f32 0.015625, %v929_v2 }
 0x33a   :  { %v932_v21 = vpop.xlane.xlu1 %931  ;;  %1491 = vmatpush3.bf16.xpose.msk.msra.mxu0 %vm2360_vm3, %v1489_v5  ;;  %v1138_v38 = vmul.f32 %v2334_v15, %v1118_v30  ;;  %v1157_v31 = vadd.f32 %v2342_v39, %v1137_v34 }
 0x33b   :  { %1590 = vrsqrt.f32 %v1073_v47  ;;  %v1074_v1 = vadd.f32 1e-05, %v1058_v53  ;;  %1492 = vmatprep.subr.bf16.mxu0 %v1599_v41  ;;  %v1012_v42 = vmul.f32 0.015625, %v932_v21  ;;  %v1043_v63 = vmul.f32 %v1011_v6, %v1011_v6  ;;  %v1181_v53 = vld [vmem:[%s2480_s5] sm:$0x1] }
 0x33c   :  { %v993_v40 = vpop.xlane.xlu0 %992  ;;  %v1158_v16 = vadd.f32 %v2342_v39, %v1138_v38  ;;  %v1173_v46 = vmax.f32 %v1157_v31, 0.0  ;;  %v1107_v62 = vsub.f32 %v2312_v36, %v1011_v6 }
 0x33d   :  { %v1587_v54 = vpop.eup %1586  ;;  %1592 = vrsqrt.f32 %v1074_v1  ;;  %v1027_v9 = vmul.f32 0.015625, %v993_v40  ;;  %v1044_v13 = vmul.f32 %v1012_v42, %v1012_v42  ;;  %v1108_v33 = vsub.f32 %v2316_v56, %v1012_v42 }
 0x33e   :  { %v1119_v26 = vmul.f32 %v1587_v54, %v1103_v22  ;;  %v996_v11 = vpop.xlane.xlu1 %995  ;;  %v1174_v10 = vmax.f32 %v1158_v16, 0.0 }
 0x33f   :  { %v1589_v23 = vpop.eup %1588  ;;  %v1059_v4 = vsub.f32 %v1027_v9, %v1043_v63  ;;  %v1028_v44 = vmul.f32 0.015625, %v996_v11 }
 0x340   :  { %v1120_v57 = vmul.f32 %v1589_v23, %v1104_v27  ;;  %v1493_v0 = vpack.c.bf16 %v1174_v10, %v1173_v46  ;;  %v1139_v35 = vmul.f32 %v2334_v15, %v1119_v26 }
 0x341   :  { %v1075_v48 = vadd.f32 1e-05, %v1059_v4  ;;  %v1060_v3 = vsub.f32 %v1028_v44, %v1044_v13 }
 0x342   :  { %1495 = vmatpush3.bf16.xpose.msk.msra.mxu0 %vm2360_vm3, %v1493_v0  ;;  %v1140_v58 = vmul.f32 %v2334_v15, %v1120_v57  ;;  %v1159_v18 = vadd.f32 %v2342_v39, %v1139_v35 }
 0x343   :  { %1594 = vrsqrt.f32 %v1075_v48  ;;  %v1076_v20 = vadd.f32 1e-05, %v1060_v3  ;;  %1496 = vmatprep.subr.bf16.mxu0 %v1599_v41 }
 0x344   :  { %v1160_v29 = vadd.f32 %v2342_v39, %v1140_v58  ;;  %v1175_v25 = vmax.f32 %v1159_v18, 0.0 }
 0x345   :  { %v1591_v12 = vpop.eup %1590  ;;  %1596 = vrsqrt.f32 %v1076_v20 }
 0x346   :  { %v1121_v14 = vmul.f32 %v1591_v12, %v1105_v17  ;;  %v1176_v43 = vmax.f32 %v1160_v29, 0.0 }
 0x347   :  { %v1593_v7 = vpop.eup %1592 }
 0x348   :  { %v1122_v52 = vmul.f32 %v1593_v7, %v1106_v28  ;;  %v1497_v37 = vpack.c.bf16 %v1176_v43, %v1175_v25  ;;  %v1141_v50 = vmul.f32 %v2334_v15, %v1121_v14 }
 0x34a   :  { %1499 = vmatpush3.bf16.xpose.msk.msra.mxu0 %vm2360_vm3, %v1497_v37  ;;  %v1142_v51 = vmul.f32 %v2334_v15, %v1122_v52  ;;  %v1161_v55 = vadd.f32 %v2342_v39, %v1141_v50 }
 0x34b   :  { %1500 = vmatprep.subr.bf16.mxu0 %v1599_v41 }
 0x34c   :  { %v1162_v49 = vadd.f32 %v2342_v39, %v1142_v51  ;;  %v1177_v61 = vmax.f32 %v1161_v55, 0.0 }
 0x34d   :  { %v1595_v19 = vpop.eup %1594 }
 0x34e   :  { %v1123_v59 = vmul.f32 %v1595_v19, %v1107_v62  ;;  %v1178_v32 = vmax.f32 %v1162_v49, 0.0 }
 0x34f   :  { %v1597_v45 = vpop.eup %1596 }
 0x350   :  { %v1143_v8 = vmul.f32 %v2334_v15, %v1123_v59  ;;  %v1124_v60 = vmul.f32 %v1597_v45, %v1108_v33  ;;  %v1501_v30 = vpack.c.bf16 %v1178_v32, %v1177_v61 }
 0x352   :  { %v1144_v2 = vmul.f32 %v2334_v15, %v1124_v60  ;;  %1503 = vmatpush3.bf16.xpose.msk.msra.mxu0 %vm2360_vm3, %v1501_v30  ;;  %v1163_v36 = vadd.f32 %v2342_v39, %v1143_v8  ;;  %v1183_v15 = vstv %s2481_s6 }
 0x353   :  { %1504 = vmatprep.subr.bf16.mxu0 %v1599_v41 }
 0x354   :  { %v1164_v5 = vadd.f32 %v2342_v39, %v1144_v2  ;;  %v1179_v56 = vmax.f32 %v1163_v36, 0.0 }
 0x356   :  { %v1180_v34 = vmax.f32 %v1164_v5, 0.0 }
 0x358   :  { %v1505_v47 = vpack.c.bf16 %v1180_v34, %v1179_v56 }
 0x35a   :  { %1507 = vmatpush3.bf16.xpose.msk.msra.mxu0 %vm2360_vm3, %v1505_v47 }
 0x361   :  { %1474 = vmatmul.mubr.msk.f32.vlgmr.msra.gmra.mrb[32].mxu0 %vm884_vm1, %v1181_v53 }
 0x434   :  { %v1301_v6 = vpop.f32.mrb[32].mxu0 }
 0x435   :  { %v1302_v41 = vadd.f32 %v1301_v6, %v1183_v15  ;;  %v1475_v21 = vpop.f32.mrb[33].mxu0 }
 0x437   :  { %1305 = vst [vmem:[%s2482_s7] sm:$0x1] %v1302_v41 }

</bundles_post_ra>
